<compile_context>
chip_gen: v6e
topology: v6e:2x2x1
jax: 0.10.0
libtpu: 0.0.40
codegen_flags: <defaults>
</compile_context>

<pallas_src>
import functools

import jax
import jax.numpy as jnp
from jax import lax
from jax.experimental import pallas as pl
from jax.experimental.pallas import tpu as pltpu

NEG_SLOPE = 0.1
EPS = 1e-5
LANE = 128


def _round_up(x, m):
    return (x + m - 1) // m * m


def _pick_tile_h(h_out, w_out, target_rows=1024):
    """Tile height giving ~target_rows matmul rows per grid step, 8-aligned."""
    th = max(1, target_rows // max(1, w_out))
    th = min(th, h_out)
    if th >= 8:
        th = (th // 8) * 8
    return th


def _vmem_limit_bytes():
    # Derive the scoped-VMEM limit per chip (64 MiB/TC on v7x, 128 MiB on
    # v5e/v6e) and leave ~25% headroom for compiler internals.
    try:
        cap = int(pltpu.get_tpu_info().vmem_capacity_bytes)
    except Exception:
        cap = 64 * 1024 * 1024
    return max(32 * 1024 * 1024, (cap * 3) // 4)


def _basic_conv_kernel(x_ref, w_ref, b_ref, o_ref, *, k, concat_dx):
    # x_ref: (1, th + k - 1, W_pad, Cin)        halo'd row slab (bf16)
    # w_ref: (k, k*Cin, Cout_p) if concat_dx    BN-folded weights (bf16)
    #        (k*k, Cin, Cout_p) otherwise
    # b_ref: (1, Cout_p)                        folded BN bias (f32)
    # o_ref: (1, th, W_out, Cout_p)             output tile (bf16)
    _, th, w_out, c_out_p = o_ref.shape
    c_in = x_ref.shape[-1]

    slab = x_ref[0]                                  # (th + k - 1, W_pad, Cin)
    acc = jnp.zeros((th * w_out, c_out_p), jnp.float32)

    for dy in range(k):                              # static, unrolled (k small)
        rows = slab[dy:dy + th]                      # (th, W_pad, Cin); H axis is
        if concat_dx:                                # not sublane/lane -> cheap slice
            # Lane-aligned Cin: concat the k dx-shifted windows along channels
            # and do ONE matmul per dy with K = k*Cin (fills the MXU depth).
            patches = jnp.concatenate(
                [rows[:, dx:dx + w_out, :] for dx in range(k)], axis=-1)
            lhs = patches.reshape(th * w_out, k * c_in)
            acc = acc + jnp.dot(lhs, w_ref[dy],
                                preferred_element_type=jnp.float32)
        else:
            # Thin channels: per-tap matmuls, no concat traffic at all.
            for dx in range(k):
                lhs = rows[:, dx:dx + w_out, :].reshape(th * w_out, c_in)
                acc = acc + jnp.dot(lhs, w_ref[dy * k + dx],
                                    preferred_element_type=jnp.float32)

    y = acc + b_ref[...]                             # folded BN bias (f32)
    y = jnp.maximum(y, NEG_SLOPE * y)                # LeakyReLU(0.1), 2 VALU ops
    o_ref[...] = y.reshape(1, th, w_out, c_out_p).astype(o_ref.dtype)


def basic_conv_forward(x_nchw, params, *, stride=1, tile_h=None):
    """BasicConv forward.  x_nchw: (N, Cin, H, W) like PyTorch."""
    w, gamma, beta, mean, var = params
    assert stride == 1, "TODO(synk): stride > 1 not implemented"
    c_out, c_in, k, k2 = w.shape
    assert k == k2 and k >= 1
    pad = (k - 1) // 2 if k else 0

    n, c_in_x, h, wdt = x_nchw.shape
    assert c_in_x == c_in
    h_out = h + 2 * pad - k + 1
    w_out = wdt + 2 * pad - k + 1
    w_pad_full = wdt + 2 * pad
    assert h_out > 0 and w_out > 0

    # Fold eval-mode BatchNorm into the conv weight (scale) and a bias.
    scale = gamma / jnp.sqrt(var + EPS)
    bias = beta - mean * scale
    w_hwio = jnp.transpose(w, (2, 3, 1, 0)) * scale          # (k, k, Cin, Cout)

    # Lane-dense OUTPUT channels only.  Cin is intentionally NOT padded to 128
    # (thin-channel layers would inflate HBM/VMEM/MXU work up to 32x); a block
    # whose last dim equals the full array dim is always accepted.
    c_out_p = _round_up(c_out, LANE)
    w_p = jnp.zeros((k, k, c_in, c_out_p), jnp.float32)
    w_p = w_p.at[..., :c_out].set(w_hwio)

    concat_dx = (c_in % LANE == 0) and (k > 1)
    if concat_dx:
        w_stack = w_p.reshape(k, k * c_in, c_out_p).astype(jnp.bfloat16)
    else:
        w_stack = w_p.reshape(k * k, c_in, c_out_p).astype(jnp.bfloat16)
    b_p = jnp.zeros((1, c_out_p), jnp.float32).at[0, :c_out].set(bias)

    # Tile over output rows; cdiv grid with a zero-padded last tile so no
    # degenerate tile sizes and no in-kernel masking.
    th = tile_h if tile_h is not None else _pick_tile_h(h_out, w_out)
    th = max(1, min(int(th), h_out))
    n_th = (h_out + th - 1) // th
    extra = n_th * th - h_out            # extra zero rows at the bottom

    # NCHW -> NHWC, spatial zero pad once here, bf16 MXU operands.
    x = jnp.transpose(x_nchw, (0, 2, 3, 1))
    x = jnp.pad(x, ((0, 0), (pad, pad + extra), (pad, pad), (0, 0)))
    x = x.astype(jnp.bfloat16)

    # Overlapping halo'd H-slabs: (N*n_th, th + k - 1, W_pad, Cin).
    slab_h = th + k - 1
    slabs = jnp.stack([x[:, t * th: t * th + slab_h] for t in range(n_th)],
                      axis=1)
    slabs = slabs.reshape(n * n_th, slab_h, w_pad_full, c_in)

    flops = 2 * n * h_out * w_out * k * k * c_in * c_out_p
    bytes_accessed = (slabs.size * 2 + w_stack.size * 2 + b_p.size * 4
                      + n * n_th * th * w_out * c_out_p * 2)

    out = pl.pallas_call(
        functools.partial(_basic_conv_kernel, k=k, concat_dx=concat_dx),
        out_shape=jax.ShapeDtypeStruct((n, n_th * th, w_out, c_out_p),
                                       jnp.bfloat16),
        grid=(n_th, n),   # tile axis leading -> rows get core-split when N small
        in_specs=[
            # Halo'd slab for this (tile, batch): VMEM scales with the tile.
            pl.BlockSpec((1, slab_h, w_pad_full, c_in),
                         lambda t, b: (b * n_th + t, 0, 0, 0)),
            # Folded weights / bias: small, resident across the grid.
            pl.BlockSpec(w_stack.shape, lambda t, b: (0, 0, 0)),
            pl.BlockSpec((1, c_out_p), lambda t, b: (0, 0)),
        ],
        out_specs=pl.BlockSpec((1, th, w_out, c_out_p),
                               lambda t, b: (b, t, 0, 0)),
        compiler_params=pltpu.CompilerParams(
            dimension_semantics=("parallel", "parallel"),
            vmem_limit_bytes=_vmem_limit_bytes(),
        ),
        cost_estimate=pl.CostEstimate(
            flops=int(flops), transcendentals=0,
            bytes_accessed=int(bytes_accessed)),
    )(slabs, w_stack, b_p)

    out = out[:, :h_out, :, :c_out]              # drop padded rows / lane channels
    return jnp.transpose(out, (0, 3, 1, 2)).astype(jnp.float32)   # NCHW, f32


def reference_forward(x_nchw, params, stride=1):
    """Pure-JAX reference (same BN folding, bf16 operands, bf16 output)."""
    w, gamma, beta, mean, var = params
    k = w.shape[-1]
    pad = (k - 1) // 2 if k else 0
    scale = gamma / jnp.sqrt(var + EPS)
    bias = beta - mean * scale
    w_hwio = jnp.transpose(w, (2, 3, 1, 0)) * scale

    x = jnp.transpose(x_nchw, (0, 2, 3, 1)).astype(jnp.bfloat16).astype(jnp.float32)
    wq = w_hwio.astype(jnp.bfloat16).astype(jnp.float32)
    y = lax.conv_general_dilated(
        x, wq, (stride, stride), [(pad, pad), (pad, pad)],
        dimension_numbers=('NHWC', 'HWIO', 'NHWC'),
        precision=lax.Precision.HIGHEST)
    y = y + bias
    y = jnp.maximum(y, NEG_SLOPE * y)
    y = y.astype(jnp.bfloat16).astype(jnp.float32)   # match kernel's bf16 output
    return jnp.transpose(y, (0, 3, 1, 2))


def make_params(key, in_channels, out_channels, kernel_size):
    kw, kg, kb, km, kv = jax.random.split(key, 5)
    w = 0.2 * jax.random.normal(
        kw, (out_channels, in_channels, kernel_size, kernel_size), jnp.float32)
    gamma = jax.random.uniform(kg, (out_channels,), jnp.float32, 0.5, 1.5)
    beta = 0.1 * jax.random.normal(kb, (out_channels,), jnp.float32)
    mean = 0.1 * jax.random.normal(km, (out_channels,), jnp.float32)
    var = jax.random.uniform(kv, (out_channels,), jnp.float32, 0.5, 1.5)
    return (w, gamma, beta, mean, var)


if __name__ == "__main__":
    key = jax.random.PRNGKey(0)
    kx1, kp1, kx2, kp2, kx3, kp3 = jax.random.split(key, 6)

    def check(out, ref, tag):
        rel = float(jnp.max(jnp.abs(out - ref) / (jnp.abs(ref) + 1.0)))
        assert rel < 2e-2, f"{tag}: max scaled err = {rel}"

    # Case 1: 3x3 BasicConv, thin channels (per-tap path), two halo'd H-tiles.
    N, Cin, Cout, H, W = 2, 4, 8, 16, 16
    x1 = jax.random.normal(kx1, (N, Cin, H, W), jnp.float32)
    p1 = make_params(kp1, Cin, Cout, 3)
    out1 = jax.block_until_ready(basic_conv_forward(x1, p1, tile_h=8))
    ref1 = reference_forward(x1, p1)
    assert out1.shape == (N, Cout, H, W), out1.shape
    check(out1, ref1, "3x3 thin")

    # Case 1b: non-dividing tile -> cdiv grid with zero-padded last tile.
    out1b = jax.block_until_ready(basic_conv_forward(x1, p1, tile_h=6))
    check(out1b, ref1, "3x3 cdiv")

    # Case 2: 1x1 BasicConv (k=1 path), single H-tile.
    x2 = jax.random.normal(kx2, (N, 8, H, W), jnp.float32)
    p2 = make_params(kp2, 8, 4, 1)
    out2 = jax.block_until_ready(basic_conv_forward(x2, p2))
    ref2 = reference_forward(x2, p2)
    assert out2.shape == (N, 4, H, W), out2.shape
    check(out2, ref2, "1x1")

    # Case 3: lane-aligned Cin=128 -> dx-concat matmul path (K = 3*128).
    x3 = jax.random.normal(kx3, (1, 128, H, W), jnp.float32)
    p3 = make_params(kp3, 128, 8, 3)
    out3 = jax.block_until_ready(basic_conv_forward(x3, p3, tile_h=8))
    ref3 = reference_forward(x3, p3)
    assert out3.shape == (1, 8, H, W), out3.shape
    check(out3, ref3, "3x3 cin128")

    print("KERNEL_OK")
</pallas_src>

<mosaic_0001>
module attributes {stable_mosaic.version = 11 : i64} {
  func.func @_basic_conv_kernel(%arg0: i32, %arg1: i32, %arg2: memref<1x10x18x4xbf16, #tpu.memory_space<vmem>>, %arg3: memref<9x4x128xbf16, #tpu.memory_space<vmem>>, %arg4: memref<1x128xf32, #tpu.memory_space<vmem>>, %arg5: memref<1x8x16x128xbf16, #tpu.memory_space<vmem>>) attributes {dimension_semantics = [#tpu.dimension_semantics<parallel>, #tpu.dimension_semantics<parallel>], iteration_bounds = array<i64: 2, 2>, scalar_prefetch = 0 : i64, scratch_operands = 0 : i64, tpu.core_type = #tpu.core_type<tc>, window_params = [{transform_indices = @transform_0, window_bounds = array<i64: 1, 10, 18, 4>}, {pipeline_mode = #tpu.pipeline_mode<synchronous>, transform_indices = @transform_1, window_bounds = array<i64: 9, 4, 128>}, {pipeline_mode = #tpu.pipeline_mode<synchronous>, transform_indices = @transform_2, window_bounds = array<i64: 1, 128>}, {transform_indices = @transform_3, window_bounds = array<i64: 1, 8, 16, 128>}]} {
    %c0 = arith.constant 0 : index
    %c0_0 = arith.constant 0 : index
    %c0_1 = arith.constant 0 : index
    %c0_2 = arith.constant 0 : index
    %0 = vector.load %arg2[%c0, %c0_0, %c0_1, %c0_2] : memref<1x10x18x4xbf16, #tpu.memory_space<vmem>>, vector<1x10x18x4xbf16>
    %1 = vector.shape_cast %0 : vector<1x10x18x4xbf16> to vector<10x18x4xbf16>
    %cst = arith.constant 0.000000e+00 : f32
    %2 = vector.broadcast %cst : f32 to vector<128x128xf32>
    %3 = vector.extract_strided_slice %1 {offsets = [0, 0, 0], sizes = [8, 18, 4], strides = [1, 1, 1]} : vector<10x18x4xbf16> to vector<8x18x4xbf16>
    %4 = vector.extract_strided_slice %3 {offsets = [0, 0, 0], sizes = [8, 16, 4], strides = [1, 1, 1]} : vector<8x18x4xbf16> to vector<8x16x4xbf16>
    %5 = vector.shape_cast %4 : vector<8x16x4xbf16> to vector<128x4xbf16>
    %c0_3 = arith.constant 0 : index
    %c0_4 = arith.constant 0 : index
    %c0_5 = arith.constant 0 : index
    %6 = vector.load %arg3[%c0_3, %c0_4, %c0_5] : memref<9x4x128xbf16, #tpu.memory_space<vmem>>, vector<1x4x128xbf16>
    %7 = vector.shape_cast %6 : vector<1x4x128xbf16> to vector<4x128xbf16>
    %cst_6 = arith.constant dense<0.000000e+00> : vector<128x128xf32>
    %8 = tpu.matmul %5, %7, %cst_6 {dimension_numbers = #tpu.dot_dimension_numbers<[1], [0], [0], [1], [0, 0, 1, 1], [], []>} : vector<128x4xbf16>, vector<4x128xbf16>, vector<128x128xf32> -> vector<128x128xf32>
    %9 = arith.addf %2, %8 : vector<128x128xf32>
    %10 = vector.extract_strided_slice %3 {offsets = [0, 1, 0], sizes = [8, 16, 4], strides = [1, 1, 1]} : vector<8x18x4xbf16> to vector<8x16x4xbf16>
    %11 = vector.shape_cast %10 : vector<8x16x4xbf16> to vector<128x4xbf16>
    %c1 = arith.constant 1 : index
    %c0_7 = arith.constant 0 : index
    %c0_8 = arith.constant 0 : index
    %12 = vector.load %arg3[%c1, %c0_7, %c0_8] : memref<9x4x128xbf16, #tpu.memory_space<vmem>>, vector<1x4x128xbf16>
    %13 = vector.shape_cast %12 : vector<1x4x128xbf16> to vector<4x128xbf16>
    %cst_9 = arith.constant dense<0.000000e+00> : vector<128x128xf32>
    %14 = tpu.matmul %11, %13, %cst_9 {dimension_numbers = #tpu.dot_dimension_numbers<[1], [0], [0], [1], [0, 0, 1, 1], [], []>} : vector<128x4xbf16>, vector<4x128xbf16>, vector<128x128xf32> -> vector<128x128xf32>
    %15 = arith.addf %9, %14 : vector<128x128xf32>
    %16 = vector.extract_strided_slice %3 {offsets = [0, 2, 0], sizes = [8, 16, 4], strides = [1, 1, 1]} : vector<8x18x4xbf16> to vector<8x16x4xbf16>
    %17 = vector.shape_cast %16 : vector<8x16x4xbf16> to vector<128x4xbf16>
    %c2 = arith.constant 2 : index
    %c0_10 = arith.constant 0 : index
    %c0_11 = arith.constant 0 : index
    %18 = vector.load %arg3[%c2, %c0_10, %c0_11] : memref<9x4x128xbf16, #tpu.memory_space<vmem>>, vector<1x4x128xbf16>
    %19 = vector.shape_cast %18 : vector<1x4x128xbf16> to vector<4x128xbf16>
    %cst_12 = arith.constant dense<0.000000e+00> : vector<128x128xf32>
    %20 = tpu.matmul %17, %19, %cst_12 {dimension_numbers = #tpu.dot_dimension_numbers<[1], [0], [0], [1], [0, 0, 1, 1], [], []>} : vector<128x4xbf16>, vector<4x128xbf16>, vector<128x128xf32> -> vector<128x128xf32>
    %21 = arith.addf %15, %20 : vector<128x128xf32>
    %22 = vector.extract_strided_slice %1 {offsets = [1, 0, 0], sizes = [8, 18, 4], strides = [1, 1, 1]} : vector<10x18x4xbf16> to vector<8x18x4xbf16>
    %23 = vector.extract_strided_slice %22 {offsets = [0, 0, 0], sizes = [8, 16, 4], strides = [1, 1, 1]} : vector<8x18x4xbf16> to vector<8x16x4xbf16>
    %24 = vector.shape_cast %23 : vector<8x16x4xbf16> to vector<128x4xbf16>
    %c3 = arith.constant 3 : index
    %c0_13 = arith.constant 0 : index
    %c0_14 = arith.constant 0 : index
    %25 = vector.load %arg3[%c3, %c0_13, %c0_14] : memref<9x4x128xbf16, #tpu.memory_space<vmem>>, vector<1x4x128xbf16>
    %26 = vector.shape_cast %25 : vector<1x4x128xbf16> to vector<4x128xbf16>
    %cst_15 = arith.constant dense<0.000000e+00> : vector<128x128xf32>
    %27 = tpu.matmul %24, %26, %cst_15 {dimension_numbers = #tpu.dot_dimension_numbers<[1], [0], [0], [1], [0, 0, 1, 1], [], []>} : vector<128x4xbf16>, vector<4x128xbf16>, vector<128x128xf32> -> vector<128x128xf32>
    %28 = arith.addf %21, %27 : vector<128x128xf32>
    %29 = vector.extract_strided_slice %22 {offsets = [0, 1, 0], sizes = [8, 16, 4], strides = [1, 1, 1]} : vector<8x18x4xbf16> to vector<8x16x4xbf16>
    %30 = vector.shape_cast %29 : vector<8x16x4xbf16> to vector<128x4xbf16>
    %c4 = arith.constant 4 : index
    %c0_16 = arith.constant 0 : index
    %c0_17 = arith.constant 0 : index
    %31 = vector.load %arg3[%c4, %c0_16, %c0_17] : memref<9x4x128xbf16, #tpu.memory_space<vmem>>, vector<1x4x128xbf16>
    %32 = vector.shape_cast %31 : vector<1x4x128xbf16> to vector<4x128xbf16>
    %cst_18 = arith.constant dense<0.000000e+00> : vector<128x128xf32>
    %33 = tpu.matmul %30, %32, %cst_18 {dimension_numbers = #tpu.dot_dimension_numbers<[1], [0], [0], [1], [0, 0, 1, 1], [], []>} : vector<128x4xbf16>, vector<4x128xbf16>, vector<128x128xf32> -> vector<128x128xf32>
    %34 = arith.addf %28, %33 : vector<128x128xf32>
    %35 = vector.extract_strided_slice %22 {offsets = [0, 2, 0], sizes = [8, 16, 4], strides = [1, 1, 1]} : vector<8x18x4xbf16> to vector<8x16x4xbf16>
    %36 = vector.shape_cast %35 : vector<8x16x4xbf16> to vector<128x4xbf16>
    %c5 = arith.constant 5 : index
    %c0_19 = arith.constant 0 : index
    %c0_20 = arith.constant 0 : index
    %37 = vector.load %arg3[%c5, %c0_19, %c0_20] : memref<9x4x128xbf16, #tpu.memory_space<vmem>>, vector<1x4x128xbf16>
    %38 = vector.shape_cast %37 : vector<1x4x128xbf16> to vector<4x128xbf16>
    %cst_21 = arith.constant dense<0.000000e+00> : vector<128x128xf32>
    %39 = tpu.matmul %36, %38, %cst_21 {dimension_numbers = #tpu.dot_dimension_numbers<[1], [0], [0], [1], [0, 0, 1, 1], [], []>} : vector<128x4xbf16>, vector<4x128xbf16>, vector<128x128xf32> -> vector<128x128xf32>
    %40 = arith.addf %34, %39 : vector<128x128xf32>
    %41 = vector.extract_strided_slice %1 {offsets = [2, 0, 0], sizes = [8, 18, 4], strides = [1, 1, 1]} : vector<10x18x4xbf16> to vector<8x18x4xbf16>
    %42 = vector.extract_strided_slice %41 {offsets = [0, 0, 0], sizes = [8, 16, 4], strides = [1, 1, 1]} : vector<8x18x4xbf16> to vector<8x16x4xbf16>
    %43 = vector.shape_cast %42 : vector<8x16x4xbf16> to vector<128x4xbf16>
    %c6 = arith.constant 6 : index
    %c0_22 = arith.constant 0 : index
    %c0_23 = arith.constant 0 : index
    %44 = vector.load %arg3[%c6, %c0_22, %c0_23] : memref<9x4x128xbf16, #tpu.memory_space<vmem>>, vector<1x4x128xbf16>
    %45 = vector.shape_cast %44 : vector<1x4x128xbf16> to vector<4x128xbf16>
    %cst_24 = arith.constant dense<0.000000e+00> : vector<128x128xf32>
    %46 = tpu.matmul %43, %45, %cst_24 {dimension_numbers = #tpu.dot_dimension_numbers<[1], [0], [0], [1], [0, 0, 1, 1], [], []>} : vector<128x4xbf16>, vector<4x128xbf16>, vector<128x128xf32> -> vector<128x128xf32>
    %47 = arith.addf %40, %46 : vector<128x128xf32>
    %48 = vector.extract_strided_slice %41 {offsets = [0, 1, 0], sizes = [8, 16, 4], strides = [1, 1, 1]} : vector<8x18x4xbf16> to vector<8x16x4xbf16>
    %49 = vector.shape_cast %48 : vector<8x16x4xbf16> to vector<128x4xbf16>
    %c7 = arith.constant 7 : index
    %c0_25 = arith.constant 0 : index
    %c0_26 = arith.constant 0 : index
    %50 = vector.load %arg3[%c7, %c0_25, %c0_26] : memref<9x4x128xbf16, #tpu.memory_space<vmem>>, vector<1x4x128xbf16>
    %51 = vector.shape_cast %50 : vector<1x4x128xbf16> to vector<4x128xbf16>
    %cst_27 = arith.constant dense<0.000000e+00> : vector<128x128xf32>
    %52 = tpu.matmul %49, %51, %cst_27 {dimension_numbers = #tpu.dot_dimension_numbers<[1], [0], [0], [1], [0, 0, 1, 1], [], []>} : vector<128x4xbf16>, vector<4x128xbf16>, vector<128x128xf32> -> vector<128x128xf32>
    %53 = arith.addf %47, %52 : vector<128x128xf32>
    %54 = vector.extract_strided_slice %41 {offsets = [0, 2, 0], sizes = [8, 16, 4], strides = [1, 1, 1]} : vector<8x18x4xbf16> to vector<8x16x4xbf16>
    %55 = vector.shape_cast %54 : vector<8x16x4xbf16> to vector<128x4xbf16>
    %c8 = arith.constant 8 : index
    %c0_28 = arith.constant 0 : index
    %c0_29 = arith.constant 0 : index
    %56 = vector.load %arg3[%c8, %c0_28, %c0_29] : memref<9x4x128xbf16, #tpu.memory_space<vmem>>, vector<1x4x128xbf16>
    %57 = vector.shape_cast %56 : vector<1x4x128xbf16> to vector<4x128xbf16>
    %cst_30 = arith.constant dense<0.000000e+00> : vector<128x128xf32>
    %58 = tpu.matmul %55, %57, %cst_30 {dimension_numbers = #tpu.dot_dimension_numbers<[1], [0], [0], [1], [0, 0, 1, 1], [], []>} : vector<128x4xbf16>, vector<4x128xbf16>, vector<128x128xf32> -> vector<128x128xf32>
    %59 = arith.addf %53, %58 : vector<128x128xf32>
    %c0_31 = arith.constant 0 : index
    %c0_32 = arith.constant 0 : index
    %60 = vector.load %arg4[%c0_31, %c0_32] : memref<1x128xf32, #tpu.memory_space<vmem>>, vector<1x128xf32>
    %61 = vector.broadcast %60 : vector<1x128xf32> to vector<128x128xf32>
    %62 = arith.addf %59, %61 : vector<128x128xf32>
    %cst_33 = arith.constant 1.000000e-01 : f32
    %63 = vector.broadcast %cst_33 : f32 to vector<128x128xf32>
    %64 = arith.mulf %63, %62 : vector<128x128xf32>
    %65 = arith.maximumf %62, %64 : vector<128x128xf32>
    %66 = vector.shape_cast %65 : vector<128x128xf32> to vector<1x8x16x128xf32>
    %67 = arith.truncf %66 : vector<1x8x16x128xf32> to vector<1x8x16x128xbf16>
    %c0_34 = arith.constant 0 : index
    %c0_35 = arith.constant 0 : index
    %c0_36 = arith.constant 0 : index
    %c0_37 = arith.constant 0 : index
    %68 = vector.load %arg5[%c0_34, %c0_35, %c0_36, %c0_37] : memref<1x8x16x128xbf16, #tpu.memory_space<vmem>>, vector<1x8x16x128xbf16>
    tpu.vector_store %arg5[%c0_34, %c0_35, %c0_36, %c0_37], %67 {strides = array<i32>} : memref<1x8x16x128xbf16, #tpu.memory_space<vmem>>, vector<1x8x16x128xbf16>,
    return
  }
  func.func @transform_0(%arg0: i32, %arg1: i32) -> (i32, i32, i32, i32) {
    %c2_i32 = arith.constant 2 : i32
    %0 = arith.muli %arg1, %c2_i32 : i32
    %1 = arith.addi %0, %arg0 : i32
    %c0_i32 = arith.constant 0 : i32
    %c0_i32_0 = arith.constant 0 : i32
    %c0_i32_1 = arith.constant 0 : i32
    %c0_i32_2 = arith.constant 0 : i32
    return %1, %c0_i32, %c0_i32_0, %c0_i32_1 : i32, i32, i32, i32
  }
  func.func @transform_1(%arg0: i32, %arg1: i32) -> (i32, i32, i32) {
    %c0_i32 = arith.constant 0 : i32
    %c0_i32_0 = arith.constant 0 : i32
    %c0_i32_1 = arith.constant 0 : i32
    %c0_i32_2 = arith.constant 0 : i32
    return %c0_i32, %c0_i32_0, %c0_i32_1 : i32, i32, i32
  }
  func.func @transform_2(%arg0: i32, %arg1: i32) -> (i32, i32) {
    %c0_i32 = arith.constant 0 : i32
    %c0_i32_0 = arith.constant 0 : i32
    %c0_i32_1 = arith.constant 0 : i32
    return %c0_i32, %c0_i32_0 : i32, i32
  }
  func.func @transform_3(%arg0: i32, %arg1: i32) -> (i32, i32, i32, i32) {
    %c0_i32 = arith.constant 0 : i32
    %c0_i32_0 = arith.constant 0 : i32
    %c0_i32_1 = arith.constant 0 : i32
    return %arg1, %arg0, %c0_i32, %c0_i32_0 : i32, i32, i32, i32
  }
}

</mosaic_0001>

<bundles_post_ra>
// kernel: tpu_custom_call.1
= control target key start
LH: loop header
LB: loop body
LE: loop exit
PB: predicated region body
PF: predicated region fallthrough
CT: control target
= control target key end

     0   :  { %8 = vsyncpa [#allocation3], 0  ;;  %s3589_s0 = inlined_call_operand.vmem [shape: bf16[4,10,18,4], index: 0, kind: input, shape index: {}]   ;;  %s3590_s1 = inlined_call_operand.vmem [shape: bf16[9,4,128], index: 1, kind: input, shape index: {}]   ;;  %s3591_s2 = inlined_call_operand.vmem [shape: f32[1,128], index: 2, kind: input, shape index: {}]   ;;  %s3592_s3 = inlined_call_operand.hbm [shape: bf16[2,16,16,128], index: 3, kind: output, shape index: {}]  }
   0x1   :  { %10 = vsyncpa [#allocation3 + $0x1], 0  ;;  %s2688_s12 = smov 0   ;;  %s2690_s13 = smov 0  }
   0x2   :  { %s2692_s14 = smov 0   ;;  %s2694_s15 = smov 0  }
   0x3   :  { %s2696_s16 = smov 0   ;;  %s2698_s17 = smov 0  }
   0x4   :  { %s2700_s18 = smov 0   ;;  %s2702_s19 = smov 0  }
   0x5 LB: > { %s2014_s20 = sadd.s32 4294967295, %s2663_s19   ;;  %s2015_s21 = sadd.s32 4294967294, %s2663_s19   ;;  %s2663_s19 = sphi %s2702_s19, %s16_s19   ;;  %s2659_s18 = sphi %s2700_s18, %s3649_s18   ;;  %s2655_s17 = sphi %s2698_s17, %s3648_s17   ;;  %s2651_s16 = sphi %s2696_s16, %s3647_s16   ;;  %s2647_s15 = sphi %s2694_s15, %s3646_s15   ;;  %s2643_s14 = sphi %s2692_s14, %s3645_s14   ;;  %s2639_s13 = sphi %s2690_s13, %s3644_s13   ;;  %s2635_s12 = sphi %s2688_s12, %s3643_s12  }
   0x6   : > { %s25_s22 = sadd.s32 1, %s2655_s17  ;;  %s28_s23 = sadd.s32 1, %s2659_s18 }
   0x7   : > { %p26_p0 = scmp.ge.s32.totalorder %s25_s22, 2  ;;  %p119_p1 = scmp.ne.s32.totalorder %s2643_s14, %s2639_s13 }
   0x8   : > { %p120_p2 = scmp.eq.s32.totalorder %s2014_s20, 3  ;;  %p125_p5 = scmp.ne.s32.totalorder %s2639_s13, %s2635_s12 }
   0x9   : > { %s3651_s22 = smov (%p26_p0, %s25_s22), 0  ;;  %s3653_s23 = smov (!%p26_p0, %s28_s23), %s2659_s18 }
   0xa   : > { %s104_s24 = ssub.s32 %s2655_s17, %s3651_s22  ;;  %p2739_p3 = por %p120_p2, %p119_p1 }
   0xb   : > { %p30_p4 = scmp.ge.s32.totalorder %s3653_s23, 2  ;;  %p126_p6 = scmp.eq.s32.totalorder %s2015_s21, 3 }
   0xc   : > { %p2020_p7 = scmp.ge.s32.totalorder %s2663_s19, 1  ;;  %p162_p9 = scmp.lt.s32.totalorder %s2663_s19, 5 }
   0xd   : > { %s3655_s23 = smov (%p30_p4, %s3653_s23), 0  ;;  %p2748_p8 = por %p126_p6, %p125_p5 }
   0xe   : > { %s105_s27 = ssub.s32 %s2659_s18, %s3655_s23  ;;  %s109_s28 = sadd.s32 1, %s2643_s14 }
   0xf   : > { %s106_s29 = sor.u32 %s105_s27, %s104_s24  ;;  %p163_p10 = pnand %p2020_p7, %p162_p9 }
  0x10   : > { %p107_p11 = scmp.eq.s32.totalorder %s106_s29, 0 }
  0x11   : > { %166 = sbr.rel (%p163_p10) target bundleno = 424 (0x1a8), region = 32 }
  0x12   : > { %s2757_s30 = scalar_select %p107_p11, %s2643_s14, %s109_s28  }
  0x16   : > { %v2024_v0 = vld [vmem:[%s3590_s1 + $0x2] sm:$0x3]  ;;  %vm476_vm0 = vcmask 1041408   ;;  %s2022_s6 = sshll.u32 %s2647_s15, 1  ;;  %v229_v2 = vld [vmem:[%s3590_s1] sm:$0x3] }
  0x17   : > { %2478 = vmatprep.subr.msk.bf16.mxu1 %vm476_vm0, %v2024_v0  ;;  %2477 = vmatprep.subr.msk.bf16.mxu0 %vm476_vm0, %v2024_v0  ;;  %v478_v1 = vsel %vm476_vm0, %v2024_v0, 0  ;;  %s189_s7 = sadd.s32 %s2651_s16, %s2022_s6  ;;  %v2065_v3 = vld [vmem:[%s3590_s1 + $0x4] sm:$0x3]  ;;  %vm230_vm1 = vsmask.f32 3328  ;;  %vm451_vm3 = vcmask 31744  }
  0x18   : > { %2476 = vmatpush3.bf16.msra.mxu1 %v478_v1  ;;  %2314 = vmatpush3.bf16.msra.mxu0 %v478_v1  ;;  %p190_p12 = scmp.lt.s32.totalorder %s189_s7, 3  ;;  %vm231_vm2 = vsmask.f32 7440  ;;  %v2804_v15 = vsel %vm476_vm0, %v229_v2, 0  ;;  %v2824_v34 = vsel %vm476_vm0, %v2065_v3, 0  ;;  %vm749_vm5 = vcmask 1042432  }
  0x19   : > { %2479 = vmatprep.subr.msk.bf16.mxu1 %vm476_vm0, %v229_v2  ;;  %2480 = vmatprep.subr.msk.bf16.mxu0 %vm476_vm0, %v2065_v3  ;;  %vm2819_vm4 = vmor %vm230_vm1, %vm231_vm2  ;;  %vm750_vm6 = vcmask 1046532   ;;  %s185_s28 = sand.u32 1, %s2639_s13   ;;  %s2184_s5 = sshll.u32 %s2651_s16, 4 }
  0x1a   : > { %s3657_s7 = smov (!%p190_p12, %s189_s7), 3  ;;  %vm2967_vm7 = vmor %vm749_vm5, %vm750_vm6  ;;  %s3478_s29 = sshll.u32 %s185_s28, 6 }
  0x1b   : > { %s2487_s20 = smul.u32 120, %s3657_s7  ;;  %s3493_s4 = scalar_lea.vmem [#allocation2], %s3478_s29 }
  0x1c   : > { %s2164_s6 = sshll.u32 %s2647_s15, 5  ;;  %s1938_s16 = sshll.u32 %s3493_s4, 4  ;;  %s3533_s16 = int_to_ptr.vmem [resolvable:$true] %s1938_s16 }
  0x1d   : > { %s2778_s27 = scalar_lea.vmem %s3589_s0, %s2487_s20  ;;  %s1935_s7 = sadd.s32 %s2184_s5, %s2164_s6 }
  0x1e   : > { %v2781_v4 = vld [vmem:[%s2778_s27] sm:$0xf]  ;;  %v2784_v5 = vld [vmem:[%s2778_s27 + $0x4] sm:$0xf]  ;;  %v2787_v6 = vld [vmem:[%s2778_s27 + $0x8] sm:$0x1] }
  0x1f   : > { %v234_v7 = vshrl.u32 %v2781_v4, 16  ;;  %v237_v8 = vshll.u32 %v2781_v4, 16  ;;  %v243_v9 = vshll.u32 %v2784_v5, 16  ;;  %v247_v10 = vshrl.u32 %v2784_v5, 16  ;;  %v2794_v11 = vld [vmem:[%s2778_s27 + $0x30] sm:$0xf] }
  0x20   : > { %v253_v12 = vshll.u32 %v2787_v6, 16  ;;  %v2798_v13 = vld [vmem:[%s2778_s27 + $0x34] sm:$0xf]  ;;  %v2801_v14 = vld [vmem:[%s2778_s27 + $0x38] sm:$0x1]  ;;  %v330_v21 = vshrl.u32 %v2794_v11, 16 }
  0x21   : > { %v236_v16 = vrot.slane %v234_v7, 4  ;;  %v239_v17 = vrot.slane %v237_v8, 5  ;;  %v245_v18 = vrot.slane %v243_v9, 5  ;;  %v249_v19 = vrot.slane %v247_v10, 4  ;;  %v2812_v28 = vld [vmem:[%s2778_s27 + $0xc] sm:$0xf] }
  0x22   : > { %v255_v20 = vrot.slane %v253_v12, 5  ;;  %v333_v22 = vshll.u32 %v2794_v11, 16  ;;  %v339_v23 = vshll.u32 %v2798_v13, 16  ;;  %v343_v26 = vshrl.u32 %v2798_v13, 16  ;;  %v2815_v29 = vld [vmem:[%s2778_s27 + $0x10] sm:$0xf] }
  0x23   : > { %v240_v24 = vor.u32 %v239_v17, %v236_v16  ;;  %v250_v25 = vor.u32 %v249_v19, %v245_v18  ;;  %v349_v27 = vshll.u32 %v2801_v14, 16  ;;  %v332_v31 = vrot.slane %v330_v21, 4  ;;  %v2827_v40 = vld [vmem:[%s2778_s27 + $0x14] sm:$0x1]  ;;  %v2838_v52 = vld [vmem:[%s2778_s27 + $0x3c] sm:$0xf] }
  0x24   : > { %v335_v32 = vrot.slane %v333_v22, 5  ;;  %v341_v33 = vrot.slane %v339_v23, 5  ;;  %v345_v37 = vrot.slane %v343_v26, 4  ;;  %v258_v41 = vshrl.u32 %v2812_v28, 16  ;;  %v2842_v57 = vld [vmem:[%s2778_s27 + $0x40] sm:$0xf] }
  0x25   : > { %v241_v35 = vrot.slane %v240_v24, 4  ;;  %v251_v36 = vrot.slane %v250_v25, 4  ;;  %v351_v38 = vrot.slane %v349_v27, 5  ;;  %v261_v42 = vshll.u32 %v2812_v28, 16  ;;  %v2850_v62 = vld [vmem:[%s2778_s27 + $0x44] sm:$0x1] }
  0x26   : > { %v336_v39 = vor.u32 %v335_v32, %v332_v31  ;;  %v267_v43 = vshll.u32 %v2815_v29, 16  ;;  %v346_v46 = vor.u32 %v345_v37, %v341_v33  ;;  %v271_v47 = vshrl.u32 %v2815_v29, 16  ;;  %v2856_v3 = vld [vmem:[%s2778_s27 + $0x18] sm:$0xf]  ;;  %v2865_v19 = vld [vmem:[%s2778_s27 + $0x1c] sm:$0xf] }
  0x27   : > { %v246_v44 = vsel %vm2819_vm4, %v241_v35, %v245_v18  ;;  %v256_v45 = vsel %vm2819_vm4, %v251_v36, %v255_v20  ;;  %v260_v50 = vrot.slane %v258_v41, 4  ;;  %v263_v51 = vrot.slane %v261_v42, 5  ;;  %v2872_v23 = vld [vmem:[%s2778_s27 + $0x20] sm:$0x1]  ;;  %v2879_v32 = vld [vmem:[%s2778_s27 + $0x48] sm:$0xf] }
  0x28   : > { %v2025_v48 = vcombine.low %v246_v44, %v256_v45  ;;  %v337_v49 = vrot.slane %v336_v39, 4  ;;  %v347_v53 = vrot.slane %v346_v46, 4  ;;  %v269_v54 = vrot.slane %v267_v43, 5  ;;  %v2892_v44 = vld [vmem:[%s2778_s27 + $0x4c] sm:$0xf]  ;;  %s2165_s15 = sshll.u32 %s1935_s7, 6 }
  0x29   : > { %v273_v55 = vrot.slane %v271_v47, 4  ;;  %v277_v56 = vshll.u32 %v2827_v40, 16  ;;  %v757_v58 = vrot.slane %v2787_v6, 5  ;;  %v264_v60 = vor.u32 %v263_v51, %v260_v50  ;;  %s3531_s10 = scalar_lea.hbm %s3592_s3, %s2165_s15  ;;  %s3538_s11 = scalar_lea.sflag [#allocation3], %s185_s28 }
  0x2a   : > { %2315 = vmatprep.mubr.msk.bf16.mxu0 %vm451_vm3, %v2025_v48  ;;  %v342_v59 = vsel %vm2819_vm4, %v337_v49, %v341_v33  ;;  %v761_v61 = vrot.slane %v2815_v29, 5  ;;  %v352_v63 = vsel %vm2819_vm4, %v347_v53, %v351_v38  ;;  %v354_v2 = vshrl.u32 %v2838_v52, 16  ;;  %v2887_v38 = vld [vmem:[%s3590_s1 + $0x8] sm:$0x3]  ;;  %s2571_s20 = scalar_lea.vmem %s3533_s16, 1024  ;;  %s2665_s21 = smov [#allocation2]  }
  0x2b   : > { %v274_v0 = vor.u32 %v273_v55, %v269_v54  ;;  %v279_v1 = vrot.slane %v277_v56, 5  ;;  %v2858_v7 = vcombine.low %v342_v59, %v352_v63  ;;  %v265_v8 = vrot.slane %v264_v60, 4  ;;  %v2906_v63 = vld [vmem:[%s2778_s27 + $0x24] sm:$0xf]  ;;  %p2572_p13 = scmp.ne.s32.totalorder %s3533_s16, %s2571_s20  ;;  %s2575_s24 = sshll.u32 %s2665_s21, 4  ;;  %s2576_s24 = int_to_ptr.vmem [resolvable:$false] %s2575_s24 }
  0x2c   : > { %v357_v9 = vshll.u32 %v2838_v52, 16  ;;  %v363_v10 = vshll.u32 %v2842_v57, 16  ;;  %v356_v16 = vrot.slane %v354_v2, 4  ;;  %v367_v17 = vshrl.u32 %v2842_v57, 16  ;;  %p2578_p2 = scmp.lt.s32.totalorder %s3533_s16, %s2576_s24 }
  0x2d   : > { %v275_v12 = vrot.slane %v274_v0, 4  ;;  %v373_v18 = vshll.u32 %v2850_v62, 16  ;;  %2323 = vmatprep.mubr.msk.bf16.mxu1 %vm451_vm3, %v2858_v7  ;;  %v270_v20 = vsel %vm2819_vm4, %v265_v8, %v269_v54  ;;  %v282_v24 = vshrl.u32 %v2856_v3, 16  ;;  %v2900_v54 = vld [vmem:[%s2778_s27 + $0x50] sm:$0x1]  ;;  %p2573_p0 = pnand %p2572_p13, %p2739_p3 }
  0x2e   : > { %v359_v21 = vrot.slane %v357_v9, 5  ;;  %v365_v22 = vrot.slane %v363_v10, 5  ;;  %v369_v26 = vrot.slane %v367_v17, 4  ;;  %v285_v31 = vshll.u32 %v2856_v3, 16  ;;  %v2914_v8 = vld [vmem:[%s2778_s27 + $0x28] sm:$0xf] }
  0x2f   : > { %v280_v25 = vsel %vm2819_vm4, %v275_v12, %v279_v1  ;;  %v375_v27 = vrot.slane %v373_v18, 5  ;;  %v284_v36 = vrot.slane %v282_v24, 4  ;;  %v291_v37 = vshll.u32 %v2865_v19, 16  ;;  %v2922_v17 = vld [vmem:[%s3590_s1 + $0x6] sm:$0x3]  ;;  %p2574_p1 = pneg %p2573_p0 }
  0x30   : > { %v2881_v33 = vcombine.low %v270_v20, %v280_v25  ;;  %v360_v35 = vor.u32 %v359_v21, %v356_v16  ;;  %v370_v39 = vor.u32 %v369_v26, %v365_v22  ;;  %v287_v41 = vrot.slane %v285_v31, 5 }
  0x31   : > { %v295_v42 = vshrl.u32 %v2865_v19, 16  ;;  %v301_v43 = vshll.u32 %v2872_v23, 16  ;;  %v293_v46 = vrot.slane %v291_v37, 5  ;;  %v378_v47 = vshrl.u32 %v2879_v32, 16 }
  0x32   : > { %2316 = vmatmul.mubr.msk.bf16.vlgmr.msra.gmra.mxu0 %vm451_vm3, %v2881_v33  ;;  %v361_v45 = vrot.slane %v360_v35, 4  ;;  %v381_v48 = vshll.u32 %v2879_v32, 16  ;;  %v371_v49 = vrot.slane %v370_v39, 4  ;;  %v288_v50 = vor.u32 %v287_v41, %v284_v36  ;;  %v2935_v35 = vld [vmem:[%s2778_s27 + $0x54] sm:$0xf] }
  0x33   : > { %2350 = vmatpush3.bf16.msra.mxu0 %v2824_v34  ;;  %v297_v51 = vrot.slane %v295_v42, 4  ;;  %v303_v53 = vrot.slane %v301_v43, 5  ;;  %v380_v56 = vrot.slane %v378_v47, 4  ;;  %v387_v60 = vshll.u32 %v2892_v44, 16  ;;  %v2942_v42 = vld [vmem:[%s2778_s27 + $0x58] sm:$0xf] }
  0x34   : > { %v366_v55 = vsel %vm2819_vm4, %v361_v45, %v365_v22  ;;  %v383_v59 = vrot.slane %v381_v48, 5  ;;  %2482 = vmatprep.subr.msk.bf16.mxu0 %vm476_vm0, %v2887_v38  ;;  %v376_v34 = vsel %vm2819_vm4, %v371_v49, %v375_v27  ;;  %v289_v0 = vrot.slane %v288_v50, 4  ;;  %v2927_v22 = vld [vmem:[%s2778_s27 + $0x2c] sm:$0x1] }
  0x35   : > { %v298_v1 = vor.u32 %v297_v51, %v293_v46  ;;  %v391_v2 = vshrl.u32 %v2892_v44, 16  ;;  %v2916_v9 = vcombine.low %v366_v55, %v376_v34  ;;  %v389_v12 = vrot.slane %v387_v60, 5 }
  0x36   : > { %v384_v10 = vor.u32 %v383_v59, %v380_v56  ;;  %v397_v16 = vshll.u32 %v2900_v54, 16  ;;  %v294_v18 = vsel %vm2819_vm4, %v289_v0, %v293_v46  ;;  %v306_v24 = vshrl.u32 %v2906_v63, 16 }
  0x37   : > { %v299_v20 = vrot.slane %v298_v1, 4  ;;  %v393_v21 = vrot.slane %v391_v2, 4  ;;  %2324 = vmatmul.mubr.msk.bf16.vlgmr.msra.gmra.mxu1 %vm451_vm3, %v2916_v9  ;;  %v309_v27 = vshll.u32 %v2906_v63, 16  ;;  %v315_v31 = vshll.u32 %v2914_v8, 16 }
  0x38   : > { %v385_v25 = vrot.slane %v384_v10, 4  ;;  %v399_v26 = vrot.slane %v397_v16, 5  ;;  %2332 = vmatpush3.bf16.msra.mxu1 %v2804_v15  ;;  %v308_v39 = vrot.slane %v306_v24, 4  ;;  %v319_v41 = vshrl.u32 %v2914_v8, 16  ;;  %v2134_v24 = vld [vmem:[%s3590_s1 + $0x10] sm:$0x3] }
  0x39   : > { %v304_v36 = vsel %vm2819_vm4, %v299_v20, %v303_v53  ;;  %v394_v37 = vor.u32 %v393_v21, %v389_v12  ;;  %v311_v46 = vrot.slane %v309_v27, 5  ;;  %v317_v47 = vrot.slane %v315_v31, 5  ;;  %2481 = vmatprep.subr.msk.bf16.mxu1 %vm476_vm0, %v2922_v17  ;;  %v2955_v53 = vld [vmem:[%s2778_s27 + $0x5c] sm:$0x1] }
  0x3a   : > { %v2944_v43 = vcombine.low %v294_v18, %v304_v36  ;;  %v390_v45 = vsel %vm2819_vm4, %v385_v25, %v389_v12  ;;  %v321_v48 = vrot.slane %v319_v41, 4  ;;  %v325_v49 = vshll.u32 %v2927_v22, 16 }
  0x3b   : > { %v395_v15 = vrot.slane %v394_v37, 4  ;;  %v402_v50 = vshrl.u32 %v2935_v35, 16  ;;  %v312_v51 = vor.u32 %v311_v46, %v308_v39  ;;  %v405_v55 = vshll.u32 %v2935_v35, 16 }
  0x3c   : > { %2319 = vmatprep.mubr.msk.bf16.mxu0 %vm451_vm3, %v2944_v43  ;;  %v411_v56 = vshll.u32 %v2942_v42, 16  ;;  %v415_v59 = vshrl.u32 %v2942_v42, 16  ;;  %v322_v34 = vor.u32 %v321_v48, %v317_v47  ;;  %v327_v0 = vrot.slane %v325_v49, 5 }
  0x3d   : > { %v400_v60 = vsel %vm2819_vm4, %v395_v15, %v399_v26  ;;  %v404_v1 = vrot.slane %v402_v50, 4  ;;  %v313_v10 = vrot.slane %v312_v51, 4  ;;  %v407_v12 = vrot.slane %v405_v55, 5 }
  0x3e   : > { %v2962_v2 = vcombine.low %v390_v45, %v400_v60  ;;  %v413_v16 = vrot.slane %v411_v56, 5  ;;  %v323_v18 = vrot.slane %v322_v34, 4  ;;  %v417_v20 = vrot.slane %v415_v59, 4 }
  0x3f   : > { %v421_v21 = vshll.u32 %v2955_v53, 16  ;;  %v2057_v25 = vrot.slane %v2781_v4, 9  ;;  %v764_v26 = vrot.slane %v2827_v40, 5  ;;  %v318_v27 = vsel %vm2819_vm4, %v313_v10, %v317_v47 }
  0x40   : > { %2327 = vmatprep.mubr.msk.bf16.mxu1 %vm451_vm3, %v2962_v2  ;;  %v408_v31 = vor.u32 %v407_v12, %v404_v1  ;;  %v754_v36 = vrot.slane %v2784_v5, 5  ;;  %v328_v37 = vsel %vm2819_vm4, %v323_v18, %v327_v0  ;;  %v418_v39 = vor.u32 %v417_v20, %v413_v16 }
  0x41   : > { %v423_v41 = vrot.slane %v421_v21, 5  ;;  %v2058_v45 = vrot.slane %v2812_v28, 9  ;;  %v2981_v46 = vcombine.low %v318_v27, %v328_v37  ;;  %v2041_v47 = vcombine.low %v2781_v4, %v2784_v5 }
  0x42   : > { %v409_v15 = vrot.slane %v408_v31, 4  ;;  %v755_v40 = vsel %vm2967_vm7, %v2057_v25, %v754_v36  ;;  %v756_v48 = vrot.slane %v754_v36, 4  ;;  %v419_v49 = vrot.slane %v418_v39, 4 }
  0x43   : > { %v762_v50 = vsel %vm2967_vm7, %v2058_v45, %v761_v61  ;;  %v763_v51 = vrot.slane %v761_v61, 4  ;;  %2320 = vmatmul.mubr.msk.bf16.gmra.mxu0 %vm451_vm3, %v2981_v46  ;;  %v2059_v4 = vrot.slane %v2856_v3, 9  ;;  %v768_v5 = vrot.slane %v2865_v19, 5 }
  0x44   : > { %v414_v55 = vsel %vm2819_vm4, %v409_v15, %v413_v16  ;;  %v758_v56 = vsel %vm2967_vm7, %v756_v48, %v757_v58  ;;  %v424_v59 = vsel %vm2819_vm4, %v419_v49, %v423_v41  ;;  %v771_v34 = vrot.slane %v2872_v23, 5 }
  0x45   : > { %v2066_v60 = vcombine.low %v755_v40, %v758_v56  ;;  %v765_v61 = vsel %vm2967_vm7, %v763_v51, %v764_v26  ;;  %v3008_v0 = vcombine.low %v414_v55, %v424_v59  ;;  %v769_v6 = vsel %vm2967_vm7, %v2059_v4, %v768_v5 }
  0x46   : > { %v770_v1 = vrot.slane %v768_v5, 4  ;;  %v785_v58 = vrot.slane %v2801_v14, 5  ;;  %v2060_v10 = vrot.slane %v2906_v63, 9  ;;  %v775_v12 = vrot.slane %v2914_v8, 5 }
  0x47   : > { %2351 = vmatprep.mubr.msk.bf16.mxu0 %vm451_vm3, %v2066_v60  ;;  %v778_v16 = vrot.slane %v2927_v22, 5  ;;  %2328 = vmatmul.mubr.msk.bf16.gmra.mxu1 %vm451_vm3, %v3008_v0  ;;  %v3019_v23 = vcombine.low %v762_v50, %v765_v61  ;;  %v2061_v20 = vrot.slane %v2794_v11, 9  ;;  %v782_v14 = vrot.slane %v2798_v13, 5 }
  0x48   : > { %v772_v18 = vsel %vm2967_vm7, %v770_v1, %v771_v34  ;;  %2333 = vmatprep.mubr.msk.bf16.mxu1 %vm451_vm3, %v2041_v47  ;;  %v777_v25 = vrot.slane %v775_v12, 4  ;;  %v1133_v22 = vsel %vm476_vm0, %v2887_v38, 0  ;;  %v2062_v27 = vrot.slane %v2838_v52, 9  ;;  %v3044_v38 = vld [vmem:[%s3590_s1 + $0xc] sm:$0x3] }
  0x49   : > { %v3026_v21 = vcombine.low %v769_v6, %v772_v18  ;;  %v784_v26 = vrot.slane %v782_v14, 4  ;;  %v789_v31 = vrot.slane %v2842_v57, 5  ;;  %v3034_v36 = vcombine.low %v2812_v28, %v2815_v29  ;;  %v3064_v47 = vld [vmem:[%s2778_s27 + $0x60] sm:$0xf] }
  0x4a   : > { %v776_v37 = vsel %vm2967_vm7, %v2060_v10, %v775_v12  ;;  %v779_v39 = vsel %vm2967_vm7, %v777_v25, %v778_v16  ;;  %v792_v41 = vrot.slane %v2850_v62, 5  ;;  %v783_v28 = vsel %vm2967_vm7, %v2061_v20, %v782_v14  ;;  %v3117_v25 = vld [vmem:[%s2778_s27 + $0x6c] sm:$0xf] }
  0x4b   : > { %2352 = vmatmul.mubr.msk.bf16.vlgmr.msra.gmra.mxu0 %vm451_vm3, %v3019_v23  ;;  %v786_v29 = vsel %vm2967_vm7, %v784_v26, %v785_v58  ;;  %v791_v45 = vrot.slane %v789_v31, 4  ;;  %v2063_v15 = vrot.slane %v2879_v32, 9  ;;  %v985_v62 = vsel %vm476_vm0, %v2922_v17, 0 }
  0x4c   : > { %2386 = vmatpush3.bf16.msra.mxu0 %v1133_v22  ;;  %v3057_v40 = vcombine.low %v2856_v3, %v2865_v19  ;;  %2355 = vmatprep.mubr.msk.bf16.mxu0 %vm451_vm3, %v3026_v21  ;;  %v796_v48 = vrot.slane %v2892_v44, 5  ;;  %v799_v49 = vrot.slane %v2900_v54, 5  ;;  %v3068_v50 = vcombine.low %v2906_v63, %v2914_v8  ;;  %v3081_v19 = vld [vmem:[%s2778_s27 + $0x64] sm:$0xf]  ;;  %v225_v54 = vld [vmem:[%s2778_s27 + $0x68] sm:$0x1] }
  0x4d   : > { %v3070_v51 = vcombine.low %v776_v37, %v779_v39  ;;  %v3074_v17 = vcombine.low %v2794_v11, %v2798_v13  ;;  %v790_v3 = vsel %vm2967_vm7, %v2062_v27, %v789_v31  ;;  %2484 = vmatprep.subr.msk.bf16.mxu0 %vm476_vm0, %v3044_v38  ;;  %v3084_v55 = vcombine.low %v783_v28, %v786_v29  ;;  %v3092_v11 = vld [vmem:[%s3590_s1 + $0xa] sm:$0x3]  ;;  %v3124_v31 = vld [vmem:[%s2778_s27 + $0x70] sm:$0xf]  ;;  %v228_v29 = vld [vmem:[%s2778_s27 + $0x74] sm:$0x1] }
  0x4e   : > { %v793_v63 = vsel %vm2967_vm7, %v791_v45, %v792_v41  ;;  %v798_v8 = vrot.slane %v796_v48, 4  ;;  %v803_v56 = vrot.slane %v2942_v42, 5  ;;  %v797_v13 = vsel %vm2967_vm7, %v2063_v15, %v796_v48  ;;  %s2577_s27 = scalar_lea.vmem %s2576_s24, 2048 }
  0x4f   : > { %2334 = vmatmul.mubr.msk.bf16.vlgmr.msra.gmra.mxu1 %vm451_vm3, %v3034_v36  ;;  %v2064_v4 = vrot.slane %v2935_v35, 9  ;;  %v1101_v5 = vshrl.u32 %v3064_v47, 16  ;;  %v1104_v59 = vshll.u32 %v3064_v47, 16  ;;  %v1114_v61 = vshrl.u32 %v3081_v19, 16  ;;  %p2579_p4 = scmp.lt.s32.totalorder %s2577_s27, %s2571_s20 }
  0x50   : > { %2368 = vmatpush3.bf16.msra.mxu1 %v985_v62  ;;  %2337 = vmatprep.mubr.msk.bf16.mxu1 %vm451_vm3, %v3057_v40  ;;  %v800_v60 = vsel %vm2967_vm7, %v798_v8, %v799_v49  ;;  %v1110_v34 = vshll.u32 %v3081_v19, 16  ;;  %v1120_v6 = vshll.u32 %v225_v54, 16  ;;  %v3107_v1 = vcombine.low %v790_v3, %v793_v63 }
  0x51   : > { %v806_v58 = vrot.slane %v2955_v53, 5  ;;  %2483 = vmatprep.subr.msk.bf16.mxu1 %vm476_vm0, %v3092_v11  ;;  %v1103_v10 = vrot.slane %v1101_v5, 4  ;;  %v1106_v12 = vrot.slane %v1104_v59, 5  ;;  %v3112_v16 = vcombine.low %v797_v13, %v800_v60  ;;  %p2580_p5 = por %p2579_p4, %p2578_p2 }
  0x52   : > { %v805_v18 = vrot.slane %v803_v56, 4  ;;  %v1112_v20 = vrot.slane %v1110_v34, 5  ;;  %v1116_v14 = vrot.slane %v1114_v61, 4  ;;  %v2102_v53 = vrot.slane %v3064_v47, 9 }
  0x53   : > { %2356 = vmatmul.mubr.msk.bf16.gmra.mxu0 %vm451_vm3, %v3070_v51  ;;  %v1107_v22 = vor.u32 %v1106_v12, %v1103_v10  ;;  %v1251_v26 = vrot.slane %v3081_v19, 5  ;;  %v1254_v27 = vrot.slane %v225_v54, 5  ;;  %v1122_v39 = vrot.slane %v1120_v6, 5  ;;  %p2581_p6 = pnand %p2580_p5, %p2574_p1 }
  0x54   : > { %2359 = vmatprep.mubr.msk.bf16.mxu0 %vm451_vm3, %v3084_v55  ;;  %v1117_v37 = vor.u32 %v1116_v14, %v1112_v20  ;;  %v1507_v41 = vshrl.u32 %v3117_v25, 16  ;;  %v1510_v28 = vshll.u32 %v3117_v25, 16  ;;  %v1520_v48 = vshrl.u32 %v3124_v31, 16 }
  0x55   : > { %v1108_v45 = vrot.slane %v1107_v22, 4  ;;  %v1252_v15 = vsel %vm2967_vm7, %v2102_v53, %v1251_v26  ;;  %v1253_v62 = vrot.slane %v1251_v26, 4  ;;  %v1516_v63 = vshll.u32 %v3124_v31, 16 }
  0x56   : > { %v1118_v49 = vrot.slane %v1117_v37, 4  ;;  %v1509_v3 = vrot.slane %v1507_v41, 4  ;;  %v1512_v54 = vrot.slane %v1510_v28, 5  ;;  %v1522_v5 = vrot.slane %v1520_v48, 4 }
  0x57   : > { %2338 = vmatmul.mubr.msk.bf16.gmra.mxu1 %vm451_vm3, %v3068_v50  ;;  %v1113_v8 = vsel %vm2819_vm4, %v1108_v45, %v1112_v20  ;;  %v1255_v13 = vsel %vm2967_vm7, %v1253_v62, %v1254_v27  ;;  %v1526_v59 = vshll.u32 %v228_v29, 16  ;;  %v1518_v6 = vrot.slane %v1516_v63, 5 }
  0x58   : > { %2341 = vmatprep.mubr.msk.bf16.mxu1 %vm451_vm3, %v3074_v17  ;;  %v1123_v60 = vsel %vm2819_vm4, %v1118_v49, %v1122_v39  ;;  %v3145_v61 = vcombine.low %v1252_v15, %v1255_v13  ;;  %v1513_v34 = vor.u32 %v1512_v54, %v1509_v3  ;;  %v2133_v12 = vrot.slane %v3117_v25, 9 }
  0x59   : > { %v3147_v10 = vcombine.low %v1113_v8, %v1123_v60  ;;  %v1657_v20 = vrot.slane %v3124_v31, 5  ;;  %v1523_v22 = vor.u32 %v1522_v5, %v1518_v6  ;;  %v1528_v53 = vrot.slane %v1526_v59, 5 }
  0x5a   : > { %v1514_v14 = vrot.slane %v1513_v34, 4  ;;  %v1660_v26 = vrot.slane %v228_v29, 5  ;;  %v2046_v27 = vcombine.low %v2838_v52, %v2842_v57  ;;  %v2047_v37 = vcombine.low %v2879_v32, %v2892_v44 }
  0x5b   : > { %2360 = vmatmul.mubr.msk.bf16.gmra.mxu0 %vm451_vm3, %v3107_v1  ;;  %v3159_v39 = vsel %vm2967_vm7, %v2133_v12, %v1657_v20  ;;  %v1659_v41 = vrot.slane %v1657_v20, 4  ;;  %v804_v52 = vsel %vm2967_vm7, %v2064_v4, %v803_v56  ;;  %v807_v57 = vsel %vm2967_vm7, %v805_v18, %v806_v58 }
  0x5c   : > { %2363 = vmatprep.mubr.msk.bf16.mxu0 %vm451_vm3, %v3112_v16  ;;  %v1519_v32 = vsel %vm2819_vm4, %v1514_v14, %v1518_v6  ;;  %v1524_v44 = vrot.slane %v1523_v22, 4  ;;  %v2073_v56 = vcombine.low %v804_v52, %v807_v57  ;;  %v2048_v58 = vcombine.low %v2935_v35, %v2942_v42  ;;  %v2123_v35 = vld [vmem:[%s3590_s1 + $0xe] sm:$0x3] }
  0x5d   : > { %v3175_v28 = vsel %vm2967_vm7, %v1659_v41, %v1660_v26  ;;  %v1391_v30 = vsel %vm476_vm0, %v3044_v38, 0  ;;  %v2083_v42 = vcombine.low %v3064_v47, %v3081_v19  ;;  %v1539_v38 = vsel %vm476_vm0, %v2123_v35, 0 }
  0x5e   : > { %v1529_v29 = vsel %vm2819_vm4, %v1524_v44, %v1528_v53  ;;  %v2135_v45 = vcombine.low %v3159_v39, %v3175_v28 }
  0x5f   : > { %2342 = vmatmul.mubr.msk.bf16.gmra.mxu1 %vm451_vm3, %v2046_v27  ;;  %v3182_v4 = vcombine.low %v1519_v32, %v1529_v29 }
  0x60   : > { %2345 = vmatprep.mubr.msk.bf16.mxu1 %vm451_vm3, %v2047_v37 }
  0x63   : > { %2364 = vmatmul.mubr.msk.bf16.gmra.mxu0 %vm451_vm3, %v2073_v56 }
  0x64   : > { %2387 = vmatprep.mubr.msk.bf16.mxu0 %vm451_vm3, %v2881_v33  ;;  %v1265_v33 = vsel %vm476_vm0, %v3092_v11, 0 }
  0x67   : > { %2346 = vmatmul.mubr.msk.bf16.gmra.mxu1 %vm451_vm3, %v2048_v58 }
  0x68   : > { %2369 = vmatprep.mubr.msk.bf16.mxu1 %vm451_vm3, %v3034_v36  ;;  %v1671_v36 = vsel %vm476_vm0, %v2134_v24, 0 }
  0x6b   : > { %2388 = vmatmul.mubr.msk.bf16.vlgmr.msra.gmra.mxu0 %vm451_vm3, %v2944_v43 }
  0x6c   : > { %2422 = vmatpush3.bf16.msra.mxu0 %v1391_v30  ;;  %2391 = vmatprep.mubr.msk.bf16.mxu0 %vm451_vm3, %v2981_v46 }
  0x6d   : > { %2486 = vmatprep.subr.msk.bf16.mxu0 %vm476_vm0, %v2134_v24 }
  0x6f   : > { %2370 = vmatmul.mubr.msk.bf16.vlgmr.msra.gmra.mxu1 %vm451_vm3, %v3057_v40 }
  0x70   : > { %2404 = vmatpush3.bf16.msra.mxu1 %v1265_v33  ;;  %2373 = vmatprep.mubr.msk.bf16.mxu1 %vm451_vm3, %v3068_v50 }
  0x71   : > { %2485 = vmatprep.subr.msk.bf16.mxu1 %vm476_vm0, %v2123_v35 }
  0x73   : > { %2392 = vmatmul.mubr.msk.bf16.gmra.mxu0 %vm451_vm3, %v2858_v7 }
  0x74   : > { %2395 = vmatprep.mubr.msk.bf16.mxu0 %vm451_vm3, %v2916_v9 }
  0x77   : > { %2374 = vmatmul.mubr.msk.bf16.gmra.mxu1 %vm451_vm3, %v3074_v17 }
  0x78   : > { %2377 = vmatprep.mubr.msk.bf16.mxu1 %vm451_vm3, %v2046_v27 }
  0x7b   : > { %2396 = vmatmul.mubr.msk.bf16.gmra.mxu0 %vm451_vm3, %v2962_v2 }
  0x7c   : > { %2399 = vmatprep.mubr.msk.bf16.mxu0 %vm451_vm3, %v3008_v0 }
  0x7f   : > { %2378 = vmatmul.mubr.msk.bf16.gmra.mxu1 %vm451_vm3, %v2047_v37 }
  0x80   : > { %2381 = vmatprep.mubr.msk.bf16.mxu1 %vm451_vm3, %v2048_v58 }
  0x83   : > { %2400 = vmatmul.mubr.msk.bf16.gmra.mxu0 %vm451_vm3, %v3147_v10 }
  0x84   : > { %2423 = vmatprep.mubr.msk.bf16.mxu0 %vm451_vm3, %v3057_v40 }
  0x87   : > { %2382 = vmatmul.mubr.msk.bf16.gmra.mxu1 %vm451_vm3, %v2083_v42 }
  0x88   : > { %2405 = vmatprep.mubr.msk.bf16.mxu1 %vm451_vm3, %v3019_v23  ;;  %v2114_v23 = vcombine.low %v3117_v25, %v3124_v31 }
  0x8b   : > { %2424 = vmatmul.mubr.msk.bf16.vlgmr.msra.gmra.mxu0 %vm451_vm3, %v3068_v50 }
  0x8c   : > { %2458 = vmatpush3.bf16.msra.mxu0 %v1671_v36  ;;  %2427 = vmatprep.mubr.msk.bf16.mxu0 %vm451_vm3, %v3074_v17 }
  0x8f   : > { %2406 = vmatmul.mubr.msk.bf16.vlgmr.msra.gmra.mxu1 %vm451_vm3, %v3026_v21 }
  0x90   : > { %2440 = vmatpush3.bf16.msra.mxu1 %v1539_v38  ;;  %2409 = vmatprep.mubr.msk.bf16.mxu1 %vm451_vm3, %v3070_v51 }
  0x93   : > { %2428 = vmatmul.mubr.msk.bf16.gmra.mxu0 %vm451_vm3, %v2046_v27 }
  0x94   : > { %2431 = vmatprep.mubr.msk.bf16.mxu0 %vm451_vm3, %v2047_v37 }
  0x97   : > { %2410 = vmatmul.mubr.msk.bf16.gmra.mxu1 %vm451_vm3, %v3084_v55 }
  0x98   : > { %2413 = vmatprep.mubr.msk.bf16.mxu1 %vm451_vm3, %v3107_v1 }
  0x9b   : > { %2432 = vmatmul.mubr.msk.bf16.gmra.mxu0 %vm451_vm3, %v2048_v58 }
  0x9c   : > { %2435 = vmatprep.mubr.msk.bf16.mxu0 %vm451_vm3, %v2083_v42 }
  0x9f   : > { %2414 = vmatmul.mubr.msk.bf16.gmra.mxu1 %vm451_vm3, %v3112_v16 }
  0xa0   : > { %2417 = vmatprep.mubr.msk.bf16.mxu1 %vm451_vm3, %v2073_v56 }
  0xa3   : > { %2436 = vmatmul.mubr.msk.bf16.gmra.mxu0 %vm451_vm3, %v2114_v23 }
  0xa4   : > { %2459 = vmatprep.mubr.msk.bf16.mxu0 %vm451_vm3, %v3026_v21 }
  0xa7   : > { %2418 = vmatmul.mubr.msk.bf16.gmra.mxu1 %vm451_vm3, %v3145_v61 }
  0xa8   : > { %2441 = vmatprep.mubr.msk.bf16.mxu1 %vm451_vm3, %v2944_v43 }
  0xab   : > { %2460 = vmatmul.mubr.msk.bf16.vlgmr.msra.gmra.mxu0 %vm451_vm3, %v3070_v51 }
  0xac   : > { %2463 = vmatprep.mubr.msk.bf16.mxu0 %vm451_vm3, %v3084_v55 }
  0xaf   : > { %2442 = vmatmul.mubr.msk.bf16.vlgmr.msra.gmra.mxu1 %vm451_vm3, %v2981_v46 }
  0xb0   : > { %2445 = vmatprep.mubr.msk.bf16.mxu1 %vm451_vm3, %v2858_v7 }
  0xb3   : > { %2464 = vmatmul.mubr.msk.bf16.gmra.mxu0 %vm451_vm3, %v3107_v1 }
  0xb4   : > { %2467 = vmatprep.mubr.msk.bf16.mxu0 %vm451_vm3, %v3112_v16 }
  0xb7   : > { %2446 = vmatmul.mubr.msk.bf16.gmra.mxu1 %vm451_vm3, %v2916_v9 }
  0xb8   : > { %2449 = vmatprep.mubr.msk.bf16.mxu1 %vm451_vm3, %v2962_v2 }
  0xbb   : > { %2468 = vmatmul.mubr.msk.bf16.gmra.mxu0 %vm451_vm3, %v2073_v56 }
  0xbc   : > { %2471 = vmatprep.mubr.msk.bf16.mxu0 %vm451_vm3, %v3145_v61 }
  0xbf   : > { %2450 = vmatmul.mubr.msk.bf16.gmra.mxu1 %vm451_vm3, %v3008_v0 }
  0xc0   : > { %2453 = vmatprep.mubr.msk.bf16.mxu1 %vm451_vm3, %v3147_v10 }
  0xc3   : > { %2472 = vmatmul.mubr.msk.bf16.gmra.mxu0 %vm451_vm3, %v2135_v45 }
  0xc7   : > { %2454 = vmatmul.mubr.msk.bf16.gmra.mxu1 %vm451_vm3, %v3182_v4 }
  0xf2   : > { %v2317_v7 = vpop.f32.mrf.mxu0 }
  0xf4   : > { %v514_v43 = vpop.f32.mrf.mxu0 }
  0xf6   : > { %v2318_v46 = vpop.f32.mrf.mxu0 }
  0xf7   : > { %v2325_v9 = vpop.f32.mrf.mxu1 }
  0xf8   : > { %v517_v40 = vpop.f32.mrf.mxu0 }
  0xf9   : > { %v546_v2 = vpop.f32.mrf.mxu1 }
  0xfb   : > { %v2326_v21 = vpop.f32.mrf.mxu1 }
  0xfd   : > { %v549_v47 = vpop.f32.mrf.mxu1 }
 0x103   : > { %v2321_v0 = vpop.f32.mrf.mxu0 }
 0x105   : > { %v530_v50 = vpop.f32.mrf.mxu0 }
 0x107   : > { %v2329_v51 = vpop.f32.mrf.mxu1  ;;  %v2322_v17 = vpop.f32.mrf.mxu0 }
 0x109   : > { %v562_v19 = vpop.f32.mrf.mxu1  ;;  %v533_v55 = vpop.f32.mrf.mxu0 }
 0x10b   : > { %v2330_v11 = vpop.f32.mrf.mxu1  ;;  %v2353_v1 = vpop.f32.mrf.mxu0 }
 0x10d   : > { %v3294_v16 = vpop.f32.mrf.mxu1  ;;  %v895_v18 = vpop.f32.mrf.mxu0 }
 0x10f   : > { %v2335_v25 = vpop.f32.mrf.mxu1  ;;  %v2354_v31 = vpop.f32.mrf.mxu0 }
 0x110   : > { %v687_v15 = vadd.f32 %v2335_v25, %v2317_v7 }
 0x111   : > { %v678_v62 = vpop.f32.mrf.mxu1  ;;  %v898_v48 = vpop.f32.mrf.mxu0 }
 0x112   : > { %v3296_v49 = vadd.f32 %v2353_v1, %v687_v15  ;;  %v679_v3 = vadd.f32 %v678_v62, %v514_v43 }
 0x113   : > { %v2336_v54 = vpop.f32.mrf.mxu1  ;;  %v2357_v63 = vpop.f32.mrf.mxu0 }
 0x114   : > { %v3298_v8 = vadd.f32 %v895_v18, %v679_v3  ;;  %v690_v13 = vadd.f32 %v2336_v54, %v2318_v46 }
 0x115   : > { %v681_v5 = vpop.f32.mrf.mxu1  ;;  %v911_v59 = vpop.f32.mrf.mxu0 }
 0x116   : > { %v3300_v60 = vadd.f32 %v2354_v31, %v690_v13  ;;  %v682_v61 = vadd.f32 %v681_v5, %v517_v40 }
 0x117   : > { %v2339_v34 = vpop.f32.mrf.mxu1  ;;  %v2358_v6 = vpop.f32.mrf.mxu0 }
 0x118   : > { %v3302_v10 = vadd.f32 %v898_v48, %v682_v61  ;;  %v703_v12 = vadd.f32 %v2339_v34, %v2321_v0 }
 0x119   : > { %v694_v20 = vpop.f32.mrf.mxu1  ;;  %v914_v14 = vpop.f32.mrf.mxu0 }
 0x11a   : > { %v3304_v22 = vadd.f32 %v2357_v63, %v703_v12  ;;  %v695_v53 = vadd.f32 %v694_v20, %v530_v50 }
 0x11b   : > { %v2340_v26 = vpop.f32.mrf.mxu1  ;;  %v2361_v27 = vpop.f32.mrf.mxu0 }
 0x11c   : > { %v3306_v37 = vadd.f32 %v911_v59, %v695_v53  ;;  %v706_v39 = vadd.f32 %v2340_v26, %v2322_v17 }
 0x11d   : > { %v697_v41 = vpop.f32.mrf.mxu1  ;;  %v927_v52 = vpop.f32.mrf.mxu0 }
 0x11e   : > { %v3308_v57 = vadd.f32 %v2358_v6, %v706_v39  ;;  %v698_v32 = vadd.f32 %v697_v41, %v533_v55 }
 0x11f   : > { %v2343_v44 = vpop.f32.mrf.mxu1  ;;  %v2362_v28 = vpop.f32.mrf.mxu0 }
 0x120   : > { %v3310_v29 = vadd.f32 %v914_v14, %v698_v32  ;;  %v719_v45 = vadd.f32 %v2343_v44, %v2325_v9 }
 0x121   : > { %v710_v56 = vpop.f32.mrf.mxu1  ;;  %v930_v4 = vpop.f32.mrf.mxu0 }
 0x122   : > { %v3312_v58 = vadd.f32 %v2361_v27, %v719_v45  ;;  %v711_v30 = vadd.f32 %v710_v56, %v546_v2 }
 0x123   : > { %v2344_v24 = vpop.f32.mrf.mxu1  ;;  %v2365_v33 = vpop.f32.mrf.mxu0 }
 0x124   : > { %v3314_v35 = vadd.f32 %v927_v52, %v711_v30  ;;  %v722_v42 = vadd.f32 %v2344_v24, %v2326_v21 }
 0x125   : > { %v713_v36 = vpop.f32.mrf.mxu1  ;;  %v943_v38 = vpop.f32.mrf.mxu0 }
 0x126   : > { %v3316_v23 = vadd.f32 %v2362_v28, %v722_v42  ;;  %v714_v7 = vadd.f32 %v713_v36, %v549_v47 }
 0x127   : > { %v2347_v43 = vpop.f32.mrf.mxu1  ;;  %v2366_v46 = vpop.f32.mrf.mxu0 }
 0x128   : > { %v3318_v40 = vadd.f32 %v930_v4, %v714_v7  ;;  %v735_v9 = vadd.f32 %v2347_v43, %v2329_v51 }
 0x129   : > { %v726_v0 = vpop.f32.mrf.mxu1  ;;  %v946_v50 = vpop.f32.mrf.mxu0 }
 0x12a   : > { %v3320_v17 = vadd.f32 %v2365_v33, %v735_v9  ;;  %v727_v2 = vadd.f32 %v726_v0, %v562_v19 }
 0x12b   : > { %v2348_v55 = vpop.f32.mrf.mxu1  ;;  %v3322_v1 = vpop.f32.mrf.mxu0 }
 0x12c   : > { %v3324_v18 = vadd.f32 %v943_v38, %v727_v2  ;;  %v738_v21 = vadd.f32 %v2348_v55, %v2330_v11 }
 0x12d   : > { %v729_v25 = vpop.f32.mrf.mxu1  ;;  %v3326_v31 = vpop.f32.mrf.mxu0 }
 0x12e   : > { %v3328_v47 = vadd.f32 %v2366_v46, %v738_v21  ;;  %v730_v15 = vadd.f32 %v729_v25, %v3294_v16 }
 0x12f   : > { %v2371_v62 = vpop.f32.mrf.mxu1  ;;  %v3331_v51 = vpop.f32.mrf.mxu0 }
 0x130   : > { %3599 = vst [vmem:[#allocation5_spill] sm:$0xff] %v3328_v47  ;;  %v3333_v48 = vadd.f32 %v946_v50, %v730_v15 }
 0x131   : > { %v1021_v3 = vpop.f32.mrf.mxu1  ;;  %v3335_v19 = vpop.f32.mrf.mxu0 }
 0x132   : > { %3600 = vst [vmem:[#allocation6_spill] sm:$0xff] %v3333_v48 }
 0x133   : > { %v2372_v54 = vpop.f32.mrf.mxu1  ;;  %v3337_v63 = vpop.f32.mrf.mxu0 }
 0x135   : > { %v1024_v13 = vpop.f32.mrf.mxu1  ;;  %v3339_v11 = vpop.f32.mrf.mxu0 }
 0x137   : > { %v2375_v5 = vpop.f32.mrf.mxu1  ;;  %v3341_v59 = vpop.f32.mrf.mxu0 }
 0x139   : > { %v1037_v61 = vpop.f32.mrf.mxu1  ;;  %v3343_v34 = vpop.f32.mrf.mxu0 }
 0x13b   : > { %v2376_v16 = vpop.f32.mrf.mxu1  ;;  %v3345_v6 = vpop.f32.mrf.mxu0 }
 0x13d   : > { %v3347_v12 = vpop.f32.mrf.mxu1  ;;  %v3349_v20 = vpop.f32.mrf.mxu0 }
 0x13f   : > { %v3351_v14 = vpop.f32.mrf.mxu1  ;;  %v3353_v53 = vpop.f32.mrf.mxu0 }
 0x141   : > { %v3355_v26 = vpop.f32.mrf.mxu1  ;;  %v3357_v27 = vpop.f32.mrf.mxu0 }
 0x143   : > { %v3359_v39 = vpop.f32.mrf.mxu1  ;;  %v3361_v41 = vpop.f32.mrf.mxu0 }
 0x144   : > { %3601 = vst [vmem:[#allocation7_spill] sm:$0xff] %v3361_v41 }
 0x145   : > { %v3363_v52 = vpop.f32.mrf.mxu1  ;;  %v3365_v32 = vpop.f32.mrf.mxu0 }
 0x146   : > { %3602 = vst [vmem:[#allocation8_spill] sm:$0xff] %v3365_v32 }
 0x147   : > { %v3367_v44 = vpop.f32.mrf.mxu1  ;;  %v3369_v28 = vpop.f32.mrf.mxu0 }
 0x148   : > { %3603 = vst [vmem:[#allocation9_spill] sm:$0xff] %v3369_v28 }
 0x149   : > { %v3371_v45 = vpop.f32.mrf.mxu1  ;;  %v3373_v56 = vpop.f32.mrf.mxu0 }
 0x14a   : > { %3604 = vst [vmem:[#allocation10_spill] sm:$0xff] %v3373_v56 }
 0x14b   : > { %v3375_v4 = vpop.f32.mrf.mxu1  ;;  %v2425_v30 = vpop.f32.mrf.mxu0 }
 0x14c   : > { %3605 = vst [vmem:[#allocation11_spill] sm:$0xff] %v3375_v4 }
 0x14d   : > { %v3377_v24 = vpop.f32.mrf.mxu1  ;;  %v1427_v33 = vpop.f32.mrf.mxu0 }
 0x14e   : > { %3606 = vst [vmem:[#allocation12_spill] sm:$0xff] %v3377_v24 }
 0x14f   : > { %v2407_v42 = vpop.f32.mrf.mxu1  ;;  %v2426_v36 = vpop.f32.mrf.mxu0 }
 0x151   : > { %v1301_v38 = vpop.f32.mrf.mxu1  ;;  %v3379_v7 = vpop.f32.mrf.mxu0 }
 0x153   : > { %v2408_v43 = vpop.f32.mrf.mxu1  ;;  %v3381_v46 = vpop.f32.mrf.mxu0 }
 0x155   : > { %v1304_v9 = vpop.f32.mrf.mxu1  ;;  %v3383_v0 = vpop.f32.mrf.mxu0 }
 0x156   : > { %3607 = vst [vmem:[#allocation13_spill] sm:$0xff] %v3383_v0 }
 0x157   : > { %v2411_v50 = vpop.f32.mrf.mxu1  ;;  %v3385_v2 = vpop.f32.mrf.mxu0 }
 0x158   : > { %3608 = vst [vmem:[#allocation14_spill] sm:$0xff] %v3385_v2 }
 0x159   : > { %v1317_v55 = vpop.f32.mrf.mxu1  ;;  %v3387_v21 = vpop.f32.mrf.mxu0 }
 0x15a   : > { %3609 = vst [vmem:[#allocation15_spill] sm:$0xff] %v3387_v21  ;;  %v1086_v21 = vadd.f32 %v2371_v62, %v3296_v49 }
 0x15b   : > { %v3389_v25 = vpop.f32.mrf.mxu1  ;;  %v3391_v15 = vpop.f32.mrf.mxu0 }
 0x15c   : > { %3610 = vst [vmem:[#allocation16_spill] sm:$0xff] %v3391_v15 }
 0x15d   : > { %v3393_v56 = vpop.f32.mrf.mxu1  ;;  %v3395_v28 = vpop.f32.mrf.mxu0 }
 0x15e   : > { %3611 = vst [vmem:[#allocation17_spill] sm:$0xff] %v3395_v28  ;;  %v1084_v28 = vadd.f32 %v1021_v3, %v3298_v8 }
 0x15f   : > { %v3397_v24 = vpop.f32.mrf.mxu1  ;;  %v3399_v48 = vpop.f32.mrf.mxu0 }
 0x160   : > { %3612 = vst [vmem:[#allocation18_spill] sm:$0xff] %v3397_v24  ;;  %3613 = vst [vmem:[#allocation19_spill] sm:$0xff] %v3399_v48  ;;  %v1234_v48 = vadd.f32 %v3322_v1, %v1086_v21  ;;  %v1232_v49 = vadd.f32 %v3326_v31, %v1084_v28  ;;  %v1088_v1 = vadd.f32 %v1037_v61, %v3306_v37 }
 0x161   : > { %v3401_v4 = vpop.f32.mrf.mxu1  ;;  %v3403_v47 = vpop.f32.mrf.mxu0  ;;  %v1089_v31 = vadd.f32 %v3347_v12, %v3310_v29  ;;  %v1092_v61 = vadd.f32 %v3355_v26, %v3314_v35  ;;  %v1095_v29 = vadd.f32 %v3359_v39, %v3316_v23  ;;  %v1098_v35 = vadd.f32 %v3367_v44, %v3320_v17 }
 0x162   : > { %3614 = vst [vmem:[#allocation20_spill] sm:$0xff] %v3401_v4  ;;  %3615 = vst [vmem:[#allocation21_spill] sm:$0xff] %v3403_v47  ;;  %v1087_v47 = vadd.f32 %v2372_v54, %v3300_v60  ;;  %v1366_v62 = vadd.f32 %v2407_v42, %v1234_v48  ;;  %v1364_v21 = vadd.f32 %v1301_v38, %v1232_v49 }
 0x163   : > { %v3405_v2 = vpop.f32.mrf.mxu1  ;;  %v3407_v32 = vpop.f32.mrf.mxu0  ;;  %v1236_v37 = vadd.f32 %v3339_v11, %v1088_v1  ;;  %v1237_v12 = vadd.f32 %v3343_v34, %v1089_v31  ;;  %v1096_v17 = vadd.f32 %v3371_v45, %v3324_v18  ;;  %v3621_v18 = vld [vmem:[#allocation7_spill] sm:$0xff] }
 0x164   : > { %3616 = vst [vmem:[#allocation22_spill] sm:$0xff] %v3405_v2  ;;  %3617 = vst [vmem:[#allocation23_spill] sm:$0xff] %v3407_v32  ;;  %v1085_v2 = vadd.f32 %v1024_v13, %v3302_v10  ;;  %v1235_v3 = vadd.f32 %v3331_v51, %v1087_v47  ;;  %v1091_v10 = vadd.f32 %v2376_v16, %v3308_v57  ;;  %v3450_v16 = vld [vmem:[%s3591_s2] ss:$0 sm:$0xff] }
 0x165   : > { %v3410_v0 = vpop.f32.mrf.mxu1  ;;  %v3412_v15 = vpop.f32.mrf.mxu0  ;;  %v1492_v48 = vadd.f32 %v2425_v30, %v1366_v62  ;;  %v1490_v51 = vadd.f32 %v1427_v33, %v1364_v21  ;;  %v1094_v57 = vadd.f32 %v3351_v14, %v3312_v58  ;;  %v1093_v58 = vadd.f32 %v3363_v52, %v3318_v40  ;;  %v3623_v21 = vld [vmem:[#allocation8_spill] sm:$0xff] }
 0x166   : > { %3618 = vst [vmem:[#allocation24_spill] sm:$0xff] %v3412_v15  ;;  %v1233_v60 = vadd.f32 %v3335_v19, %v1085_v2  ;;  %v1367_v28 = vadd.f32 %v2408_v43, %v1235_v3  ;;  %v1239_v19 = vadd.f32 %v3341_v59, %v1091_v10  ;;  %v1240_v43 = vadd.f32 %v3349_v20, %v1092_v61 }
 0x167   : > { %v3415_v41 = vpop.f32.mrf.mxu1  ;;  %v3417_v24 = vpop.f32.mrf.mxu0  ;;  %v1243_v40 = vadd.f32 %v3353_v53, %v1095_v29  ;;  %v1246_v45 = vadd.f32 %v3621_v18, %v1098_v35  ;;  %v3624_v10 = vld [vmem:[#allocation18_spill] sm:$0xff] }
 0x168   : > { %3619 = vst [vmem:[#allocation25_spill] sm:$0xff] %v3417_v24  ;;  %v1090_v24 = vadd.f32 %v2375_v5, %v3304_v22  ;;  %v1365_v42 = vadd.f32 %v1304_v9, %v1233_v60  ;;  %v1244_v60 = vadd.f32 %v3623_v21, %v1096_v17  ;;  %v3631_v17 = vld [vmem:[#allocation11_spill] sm:$0xff] }
 0x169   : > { %v3422_v4 = vpop.f32.mrf.mxu1  ;;  %v3424_v32 = vpop.f32.mrf.mxu0 }
 0x16a   : > { %3620 = vst [vmem:[#allocation26_spill] sm:$0xff] %v3424_v32  ;;  %v1238_v22 = vadd.f32 %v3337_v63, %v1090_v24  ;;  %v1491_v23 = vadd.f32 %v3379_v7, %v1365_v42  ;;  %v1368_v24 = vadd.f32 %v1317_v55, %v1236_v37  ;;  %v1371_v7 = vadd.f32 %v3389_v25, %v1239_v19  ;;  %v3626_v37 = vld [vmem:[#allocation15_spill] sm:$0xff] }
 0x16b   : > { %v3427_v15 = vpop.f32.mrf.mxu1  ;;  %v2461_v8 = vpop.f32.mrf.mxu0  ;;  %v1241_v55 = vadd.f32 %v3357_v27, %v1093_v58  ;;  %v3629_v35 = vld [vmem:[#allocation22_spill] sm:$0xff] }
 0x16c   : > { %v1370_v14 = vadd.f32 %v2411_v50, %v1238_v22 }
 0x16d   : > { %v3434_v54 = vpop.f32.mrf.mxu1  ;;  %v1707_v13 = vpop.f32.mrf.mxu0 }
 0x16e   : > { %v1496_v49 = vadd.f32 %v3381_v46, %v1370_v14 }
 0x16f   : > { %v2443_v32 = vpop.f32.mrf.mxu1  ;;  %v2462_v47 = vpop.f32.mrf.mxu0 }
 0x170   : > { %v1640_v5 = vadd.f32 %v2443_v32, %v1492_v48  ;;  %v1493_v32 = vadd.f32 %v2426_v36, %v1367_v28  ;;  %v1242_v36 = vadd.f32 %v3345_v6, %v1094_v57  ;;  %v1369_v6 = vadd.f32 %v3393_v56, %v1237_v12  ;;  %v3625_v48 = vld [vmem:[#allocation14_spill] sm:$0xff] }
 0x171   : > { %v1575_v63 = vpop.f32.mrf.mxu1  ;;  %v1710_v11 = vpop.f32.mrf.mxu0  ;;  %v1497_v28 = vadd.f32 %v3625_v48, %v1371_v7  ;;  %v3633_v7 = vld [vmem:[#allocation12_spill] sm:$0xff] }
 0x172   : > { %v1772_v59 = vadd.f32 %v2461_v8, %v1640_v5  ;;  %v1638_v30 = vadd.f32 %v1575_v63, %v1490_v51  ;;  %v3622_v8 = vld [vmem:[#allocation13_spill] sm:$0xff]  ;;  %v1374_v27 = vadd.f32 %v3624_v10, %v1242_v36  ;;  %v1495_v51 = vadd.f32 %v3626_v37, %v1369_v6  ;;  %v3627_v5 = vld [vmem:[#allocation20_spill] sm:$0xff] }
 0x173   : > { %v2444_v26 = vpop.f32.mrf.mxu1  ;;  %v2465_v39 = vpop.f32.mrf.mxu0  ;;  %v1494_v3 = vadd.f32 %v3622_v8, %v1368_v24  ;;  %v1372_v19 = vadd.f32 %v3627_v5, %v1240_v43  ;;  %v3630_v43 = vld [vmem:[#allocation5_spill] sm:$0xff]  ;;  %v3635_v8 = vld [vmem:[#allocation19_spill] sm:$0xff] }
 0x174   : > { %v1795_v33 = vadd.f32 %v3450_v16, %v1772_v59  ;;  %v1770_v38 = vadd.f32 %v1707_v13, %v1638_v30  ;;  %v1641_v34 = vadd.f32 %v2444_v26, %v1493_v32  ;;  %v3628_v30 = vld [vmem:[#allocation16_spill] sm:$0xff] }
 0x175   : > { %v1578_v52 = vpop.f32.mrf.mxu1  ;;  %v1723_v44 = vpop.f32.mrf.mxu0  ;;  %v1500_v58 = vadd.f32 %v3628_v30, %v1374_v27 }
 0x176   : > { %v1793_v9 = vadd.f32 %v3450_v16, %v1770_v38  ;;  %v1773_v50 = vadd.f32 %v2462_v47, %v1641_v34  ;;  %v1639_v2 = vadd.f32 %v1578_v52, %v1491_v23  ;;  %v1811_v20 = vmul.f32 0.1, %v1795_v33 }
 0x177   : > { %v2447_v53 = vpop.f32.mrf.mxu1  ;;  %v2466_v62 = vpop.f32.mrf.mxu0  ;;  %v1375_v23 = vadd.f32 %v3629_v35, %v1243_v40  ;;  %v1099_v52 = vadd.f32 %v3631_v17, %v3630_v43  ;;  %v3641_v17 = vld [vmem:[#allocation25_spill] sm:$0xff] }
 0x178   : > { %v1796_v25 = vadd.f32 %v3450_v16, %v1773_v50  ;;  %v1771_v1 = vadd.f32 %v1710_v11, %v1639_v2  ;;  %v1809_v13 = vmul.f32 0.1, %v1793_v9  ;;  %v1644_v46 = vadd.f32 %v2447_v53, %v1496_v49 }
 0x179   : > { %v1591_v31 = vpop.f32.mrf.mxu1  ;;  %v1726_v56 = vpop.f32.mrf.mxu0  ;;  %v1827_v57 = vmax.f32 %v1795_v33, %v1811_v20 }
 0x17a   : > { %v1812_v42 = vmul.f32 0.1, %v1796_v25  ;;  %v1794_v47 = vadd.f32 %v3450_v16, %v1771_v1  ;;  %v1642_v22 = vadd.f32 %v1591_v31, %v1494_v3  ;;  %v1776_v61 = vadd.f32 %v2465_v39, %v1644_v46 }
 0x17b   : > { %v2448_v29 = vpop.f32.mrf.mxu1  ;;  %v2469_v63 = vpop.f32.mrf.mxu0  ;;  %v1825_v14 = vmax.f32 %v1793_v9, %v1809_v13  ;;  %v3634_v9 = vld [vmem:[#allocation17_spill] sm:$0xff]  ;;  %v1501_v3 = vadd.f32 %v3635_v8, %v1375_v23  ;;  %v1378_v1 = vadd.f32 %v3415_v41, %v1246_v45 }
 0x17c   : > { %v1828_v11 = vmax.f32 %v1796_v25, %v1812_v42  ;;  %v1810_v12 = vmul.f32 0.1, %v1794_v47  ;;  %v1774_v32 = vadd.f32 %v1723_v44, %v1642_v22  ;;  %v1645_v59 = vadd.f32 %v2448_v29, %v1497_v28  ;;  %v3632_v44 = vld [vmem:[#allocation6_spill] sm:$0xff]  ;;  %v3636_v28 = vld [vmem:[#allocation9_spill] sm:$0xff]  ;;  %v3639_v29 = vld [vmem:[#allocation23_spill] sm:$0xff] }
 0x17d   : > { %v1799_v26 = vadd.f32 %v3450_v16, %v1776_v61  ;;  %v1594_v24 = vpop.f32.mrf.mxu1  ;;  %v1739_v38 = vpop.f32.mrf.mxu0  ;;  %v1097_v50 = vadd.f32 %v3633_v7, %v3632_v44  ;;  %v1498_v20 = vadd.f32 %v3634_v9, %v1372_v19  ;;  %v1373_v25 = vadd.f32 %v3410_v0, %v1241_v55 }
 0x17e   : > { %v2193_v34 = vpack.c.bf16 %v1828_v11, %v1827_v57  ;;  %v1826_v36 = vmax.f32 %v1794_v47, %v1810_v12  ;;  %v1797_v39 = vadd.f32 %v3450_v16, %v1774_v32  ;;  %v1777_v33 = vadd.f32 %v2466_v62, %v1645_v59  ;;  %v3638_v57 = vld [vmem:[#allocation21_spill] sm:$0xff] }
 0x17f   : > { %v1815_v2 = vmul.f32 0.1, %v1799_v26  ;;  %v1643_v49 = vadd.f32 %v1594_v24, %v1495_v51  ;;  %v2451_v40 = vpop.f32.mrf.mxu1  ;;  %v2470_v6 = vpop.f32.mrf.mxu0  ;;  %v1247_v42 = vadd.f32 %v3636_v28, %v1099_v52  ;;  %v1376_v47 = vadd.f32 %v3422_v4, %v1244_v60 }
 0x180   : > { %2225 = vst [vmem:[%s3493_s4 + $0x8] sm:$0xff] %v2193_v34   ;;  %v2188_v53 = vpack.c.bf16 %v1826_v36, %v1825_v14  ;;  %v1800_v62 = vadd.f32 %v3450_v16, %v1777_v33  ;;  %v1648_v18 = vadd.f32 %v2451_v40, %v1500_v58  ;;  %v1813_v13 = vmul.f32 0.1, %v1797_v39 }
 0x181   : > { %v1775_v21 = vadd.f32 %v1726_v56, %v1643_v49  ;;  %v1607_v10 = vpop.f32.mrf.mxu1  ;;  %v1742_v27 = vpop.f32.mrf.mxu0  ;;  %v1831_v22 = vmax.f32 %v1799_v26, %v1815_v2  ;;  %v3637_v56 = vld [vmem:[#allocation10_spill] sm:$0xff]  ;;  %v1499_v61 = vadd.f32 %v3638_v57, %v1373_v25  ;;  %v1379_v4 = vadd.f32 %v3427_v15, %v1247_v42  ;;  %v3640_v26 = vld [vmem:[#allocation24_spill] sm:$0xff] }
 0x182   : > { %2189 = vst [vmem:[%s3493_s4] sm:$0xff] %v2188_v53   ;;  %v1816_v46 = vmul.f32 0.1, %v1800_v62  ;;  %v1780_v31 = vadd.f32 %v2469_v63, %v1648_v18  ;;  %v1646_v48 = vadd.f32 %v1607_v10, %v1498_v20  ;;  %v1245_v19 = vadd.f32 %v3637_v56, %v1097_v50  ;;  %v3642_v18 = vld [vmem:[#allocation26_spill] sm:$0xff] }
 0x183   : > { %v1798_v37 = vadd.f32 %v3450_v16, %v1775_v21  ;;  %v2452_v51 = vpop.f32.mrf.mxu1  ;;  %v2473_v45 = vpop.f32.mrf.mxu0  ;;  %v1504_v63 = vadd.f32 %v3639_v29, %v1378_v1  ;;  %v1829_v60 = vmax.f32 %v1797_v39, %v1813_v13  ;;  %v1502_v24 = vadd.f32 %v3640_v26, %v1376_v47 }
 0x184   : > { %v1832_v5 = vmax.f32 %v1800_v62, %v1816_v46  ;;  %v1803_v0 = vadd.f32 %v3450_v16, %v1780_v31  ;;  %v1778_v41 = vadd.f32 %v1739_v38, %v1646_v48  ;;  %v1649_v55 = vadd.f32 %v2452_v51, %v1501_v3 }
 0x185   : > { %v1814_v11 = vmul.f32 0.1, %v1798_v37  ;;  %v1610_v12 = vpop.f32.mrf.mxu1  ;;  %v1755_v36 = vpop.f32.mrf.mxu0  ;;  %v1377_v33 = vadd.f32 %v3434_v54, %v1245_v19  ;;  %v1505_v52 = vadd.f32 %v3641_v17, %v1379_v4 }
 0x186   : > { %v2203_v32 = vpack.c.bf16 %v1832_v5, %v1831_v22  ;;  %v1781_v59 = vadd.f32 %v2470_v6, %v1649_v55  ;;  %v1819_v58 = vmul.f32 0.1, %v1803_v0  ;;  %v1801_v35 = vadd.f32 %v3450_v16, %v1778_v41 }
 0x187   : > { %v1830_v30 = vmax.f32 %v1798_v37, %v1814_v11  ;;  %v1647_v23 = vadd.f32 %v1610_v12, %v1499_v61  ;;  %v2455_v14 = vpop.f32.mrf.mxu1  ;;  %v2474_v62 = vpop.f32.mrf.mxu0  ;;  %v1503_v8 = vadd.f32 %v3642_v18, %v1377_v33 }
 0x188   : > { %2227 = vst [vmem:[%s3493_s4 + $0x18] sm:$0xff] %v2203_v32   ;;  %v1804_v38 = vadd.f32 %v3450_v16, %v1781_v59  ;;  %v1652_v34 = vadd.f32 %v2455_v14, %v1504_v63  ;;  %v1835_v2 = vmax.f32 %v1803_v0, %v1819_v58  ;;  %v1817_v49 = vmul.f32 0.1, %v1801_v35 }
 0x189   : > { %v2198_v15 = vpack.c.bf16 %v1830_v30, %v1829_v60  ;;  %v1779_v39 = vadd.f32 %v1742_v27, %v1647_v23  ;;  %v1623_v43 = vpop.f32.mrf.mxu1  ;;  %v1758_v28 = vpop.f32.mrf.mxu0 }
 0x18a   : > { %v1820_v44 = vmul.f32 0.1, %v1804_v38  ;;  %v1784_v7 = vadd.f32 %v2473_v45, %v1652_v34  ;;  %v1650_v50 = vadd.f32 %v1623_v43, %v1502_v24  ;;  %v1833_v10 = vmax.f32 %v1801_v35, %v1817_v49 }
 0x18b   : > { %2226 = vst [vmem:[%s3493_s4 + $0x10] sm:$0xff] %v2198_v15   ;;  %v1802_v40 = vadd.f32 %v3450_v16, %v1779_v39  ;;  %v2456_v6 = vpop.f32.mrf.mxu1 }
 0x18c   : > { %v1836_v9 = vmax.f32 %v1804_v38, %v1820_v44  ;;  %v1807_v54 = vadd.f32 %v3450_v16, %v1784_v7  ;;  %v1782_v20 = vadd.f32 %v1755_v36, %v1650_v50  ;;  %v1653_v53 = vadd.f32 %v2456_v6, %v1505_v52 }
 0x18d   : > { %v1818_v3 = vmul.f32 0.1, %v1802_v40  ;;  %v1626_v25 = vpop.f32.mrf.mxu1 }
 0x18e   : > { %v2213_v1 = vpack.c.bf16 %v1836_v9, %v1835_v2  ;;  %v1785_v21 = vadd.f32 %v2474_v62, %v1653_v53  ;;  %v1805_v13 = vadd.f32 %v3450_v16, %v1782_v20  ;;  %v1651_v46 = vadd.f32 %v1626_v25, %v1503_v8 }
 0x18f   : > { %v1834_v27 = vmax.f32 %v1802_v40, %v1818_v3  ;;  %v1823_v31 = vmul.f32 0.1, %v1807_v54 }
 0x190   : > { %2229 = vst [vmem:[%s3493_s4 + $0x28] sm:$0xff] %v2213_v1   ;;  %v1808_v48 = vadd.f32 %v3450_v16, %v1785_v21  ;;  %v1783_v47 = vadd.f32 %v1758_v28, %v1651_v46  ;;  %v1821_v37 = vmul.f32 0.1, %v1805_v13 }
 0x191   : > { %v2208_v42 = vpack.c.bf16 %v1834_v27, %v1833_v10  ;;  %v1839_v5 = vmax.f32 %v1807_v54, %v1823_v31 }
 0x192   : > { %v1824_v22 = vmul.f32 0.1, %v1808_v48  ;;  %v1806_v51 = vadd.f32 %v3450_v16, %v1783_v47  ;;  %v1837_v45 = vmax.f32 %v1805_v13, %v1821_v37 }
 0x193   : > { %2228 = vst [vmem:[%s3493_s4 + $0x20] sm:$0xff] %v2208_v42  }
 0x194   : > { %v1840_v0 = vmax.f32 %v1808_v48, %v1824_v22  ;;  %v1822_v41 = vmul.f32 0.1, %v1806_v51 }
 0x196   : > { %v2223_v55 = vpack.c.bf16 %v1840_v0, %v1839_v5  ;;  %v1838_v56 = vmax.f32 %v1806_v51, %v1822_v41 }
 0x198   : > { %2231 = vst [vmem:[%s3493_s4 + $0x38] sm:$0xff] %v2223_v55   ;;  %v2218_v16 = vpack.c.bf16 %v1838_v56, %v1837_v45 }
 0x19a   : > { %2230 = vst [vmem:[%s3493_s4 + $0x30] sm:$0xff] %v2218_v16  }
 0x19b   : > { %2584 = shalt.err (!%p2581_p6)
}
 0x19c   : > { %s2585_s28 = scalar_lea.hbm %s3531_s10, 1024  ;;  %s2589_s5 = scalar_lea.hbm %s3592_s3, 4096 }
 0x19d   : > { %p2586_p7 = scmp.ne.s32.totalorder %s3531_s10, %s2585_s28  ;;  %p2590_p11 = scmp.lt.s32.totalorder %s3531_s10, %s3592_s3 }
 0x19e   : > { %p2591_p12 = scmp.lt.s32.totalorder %s2589_s5, %s2585_s28 }
 0x19f   : > { %p2587_p9 = pnand %p2586_p7, %p2739_p3 }
 0x1a0   : > { %p2592_p13 = por %p2591_p12, %p2590_p11 }
 0x1a1   : > { %p2588_p10 = pneg %p2587_p9 }
 0x1a3   : > { %p2593_p0 = pnand %p2592_p13, %p2588_p10 }
 0x1a5   : > { %2596 = shalt.err (!%p2593_p0)
}
 0x1a6   : > { %s2666_s15 = smov 64   ;;  %s2667_s8 = smov 4  }
 0x1a7   : > { %2488 = dma.vmem_to_hbm [thread:$0]  (%p2739_p3), %s3533_s16, 1024, %s3531_s10, %s3538_s11, %s2666_s15, %s2666_s15, %s2667_s8  }
 0x1a8 PF: > { %p2494_p1 = scmp.ge.s32.totalorder %s2663_s19, 2  ;;  %s1953_s9 = sand.u32 1, %s2635_s12  }
 0x1a9   : > { %s1954_s20 = scalar_lea.sflag [#allocation3], %s1953_s9 }
 0x1aa   : > { %p2491_p2 = pnand %p2494_p1, %p2748_p8 }
 0x1ac   : > { %p2492_p4 = pneg %p2491_p2 }
 0x1ae   : > { %2630 = dma.done.wait (%p2492_p4), %s1954_s20, 1024  }
 0x1af   : > { %2632 = vsyncadd (%p2492_p4), %s1954_s20, 4294966272  ;;  %s16_s19 = sadd.s32 1, %s2663_s19   ;;  %s3643_s12 = smov %s2639_s13 }
 0x1b0   : > { %p13_p5 = scmp.ge.s32.totalorder %s16_s19, 6   ;;  %s3644_s13 = smov %s2643_s14 }
 0x1b1   : > { %s3645_s14 = smov %s2757_s30  ;;  %s3646_s15 = smov %s2655_s17 }
 0x1b2   : > { %s3647_s16 = smov %s2659_s18  ;;  %s3648_s17 = smov %s3651_s22 }
 0x1b3   : > { %s3649_s18 = smov %s3655_s23  ;;  %15 = sbr.rel (!%p13_p5) target bundleno = 5 (0x5), region = 75 }
 0x1b8   :  { %1959 = vsyncpa [#allocation3], 1 }
 0x1b9   :  { %1961 = vsyncpa [#allocation3 + $0x1], 1 }

</bundles_post_ra>
